<compile_context>
chip_gen: v7x
topology: tpu7x:2x2x1
jax: 0.10.0
libtpu: 0.0.40
codegen_flags: <defaults>
</compile_context>

<pallas_src>
import jax
import jax.numpy as jnp
from jax.experimental import pallas as pl
from jax.experimental.pallas import tpu as pltpu

IN_DIM = 18
K_PAD = 128          # layer-1 K padded to one full lane tile
HID = 512
OUT_DIM = 1
BN_EPS = 1e-5


# ----------------------------------------------------------------------------
# Kernel
# ----------------------------------------------------------------------------
def mlp_kernel(x_ref,
               w1_ref, b1_ref,
               w2_ref, b2_ref,
               w3_ref, b3_ref,
               w4_ref, b4_ref,
               out_ref):
    bf16 = jnp.bfloat16

    # Block 1: Linear(18->512) [+folded BN] + ReLU.
    # x / w1 stay f32 (input features may be un-normalized); bf16 epilogue.
    h = jnp.dot(x_ref[...], w1_ref[...], preferred_element_type=jnp.float32)
    h = jnp.maximum(h.astype(bf16) + b1_ref[...], 0)

    # Block 2: Linear(512,512) [+folded BN] + ReLU  (bf16 MXU, f32 accumulate).
    h = jnp.dot(h, w2_ref[...], preferred_element_type=jnp.float32)
    h = jnp.maximum(h.astype(bf16) + b2_ref[...], 0)

    # Block 3: Linear(512,512) [+folded BN] + ReLU.
    h = jnp.dot(h, w3_ref[...], preferred_element_type=jnp.float32)
    h = jnp.maximum(h.astype(bf16) + b3_ref[...], 0)

    # Head: Linear(512,1) as a VPU broadcast-multiply + lane reduction (f32).
    y = jnp.sum(h.astype(jnp.float32) * w4_ref[...], axis=-1, keepdims=True)
    out_ref[...] = (y + b4_ref[...]).astype(out_ref.dtype)


# ----------------------------------------------------------------------------
# Wrapper
# ----------------------------------------------------------------------------
def _round_up(n, m):
    return ((n + m - 1) // m) * m


def _choose_tb(B):
    """Batch-tile selection.

    * B <= 128: single grid step, minimal row padding (multiple of 16 for
      bf16 sublane packing).
    * B  > 128: at least 2 grid steps (so the "parallel" batch axis shards
      across v7x's 2 TensorCores), tile rounded to 128, capped at 1024 to
      amortize the ~0.35 us/step pipeline overhead.
    """
    if B <= 128:
        return _round_up(max(B, 1), 16)
    half = _round_up((B + 1) // 2, 128)
    return min(1024, half)


def neural_net_forward(x, kparams, tb=None):
    """x: (B, 18) f32 -> (B, 1) f32, using BN-folded kernel params."""
    B = x.shape[0]
    TB = _choose_tb(B) if tb is None else tb
    B_pad = _round_up(B, TB)

    # Pad rows to B_pad and features 18 -> 128 (aligned, unmasked loads).
    x = jnp.pad(x, ((0, B_pad - B), (0, K_PAD - IN_DIM)))
    grid = (B_pad // TB,)

    const = lambda i: (0, 0)           # weight blocks: VMEM-resident
    in_specs = [
        pl.BlockSpec((TB, K_PAD), lambda i: (i, 0)),    # x, pipelined over batch
        pl.BlockSpec((K_PAD, HID), const),              # w1 (f32, K padded)
        pl.BlockSpec((1, HID), const),                  # b1 (bf16, BN folded)
        pl.BlockSpec((HID, HID), const),                # w2 (bf16)
        pl.BlockSpec((1, HID), const),                  # b2 (bf16)
        pl.BlockSpec((HID, HID), const),                # w3 (bf16)
        pl.BlockSpec((1, HID), const),                  # b3 (bf16)
        pl.BlockSpec((1, HID), const),                  # w4 row (f32)
        pl.BlockSpec((1, 1), const),                    # b4 (f32)
    ]
    out_specs = pl.BlockSpec((TB, OUT_DIM), lambda i: (i, 0))

    out = pl.pallas_call(
        mlp_kernel,
        out_shape=jax.ShapeDtypeStruct((B_pad, OUT_DIM), jnp.float32),
        grid_spec=pltpu.PrefetchScalarGridSpec(
            num_scalar_prefetch=0,
            grid=grid,
            in_specs=in_specs,
            out_specs=out_specs,
        ),
        compiler_params=pltpu.CompilerParams(
            dimension_semantics=("parallel",),
        ),
    )(
        x,
        kparams["w1"], kparams["b1"],
        kparams["w2"], kparams["b2"],
        kparams["w3"], kparams["b3"],
        kparams["w4_row"], kparams["b4"],
    )
    return out[:B]


# ----------------------------------------------------------------------------
# Parameter construction (raw, torch-like) and host-side folding
# ----------------------------------------------------------------------------
def make_raw_params(key):
    keys = jax.random.split(key, 22)
    k = iter(keys)

    def lin(fan_in, fan_out):
        bound = 1.0 / jnp.sqrt(float(fan_in))
        w = jax.random.uniform(next(k), (fan_in, fan_out), jnp.float32, -bound, bound)
        b = jax.random.uniform(next(k), (1, fan_out), jnp.float32, -bound, bound)
        return w, b

    def bn(n):
        gamma = 1.0 + 0.1 * jax.random.normal(next(k), (1, n), jnp.float32)
        beta = 0.05 * jax.random.normal(next(k), (1, n), jnp.float32)
        mean = 0.05 * jax.random.normal(next(k), (1, n), jnp.float32)
        var = jax.random.uniform(next(k), (1, n), jnp.float32, 0.5, 1.5)
        return gamma, beta, mean, var

    p = {}
    p["w1"], p["b1"] = lin(IN_DIM, HID)
    p["g1"], p["be1"], p["m1"], p["v1"] = bn(HID)
    p["w2"], p["b2"] = lin(HID, HID)
    p["g2"], p["be2"], p["m2"], p["v2"] = bn(HID)
    p["w3"], p["b3"] = lin(HID, HID)
    p["g3"], p["be3"], p["m3"], p["v3"] = bn(HID)
    p["w4"], p["b4"] = lin(HID, OUT_DIM)
    return p


def fold_bn(raw):
    """Fold eval-mode BN into the preceding Linear (all f32)."""
    def fold(w, b, gamma, beta, mean, var):
        s = gamma / jnp.sqrt(var + BN_EPS)     # (1, HID)
        t = beta - mean * s                    # (1, HID)
        return w * s, b * s + t

    f = {}
    f["w1"], f["b1"] = fold(raw["w1"], raw["b1"], raw["g1"], raw["be1"], raw["m1"], raw["v1"])
    f["w2"], f["b2"] = fold(raw["w2"], raw["b2"], raw["g2"], raw["be2"], raw["m2"], raw["v2"])
    f["w3"], f["b3"] = fold(raw["w3"], raw["b3"], raw["g3"], raw["be3"], raw["m3"], raw["v3"])
    f["w4"], f["b4"] = raw["w4"], raw["b4"]
    return f


def to_kernel_params(folded):
    """w1 kept f32 with K padded to 128; hidden weights/biases bf16; head f32."""
    w1p = jnp.pad(folded["w1"], ((0, K_PAD - IN_DIM), (0, 0)))     # (128, 512) f32
    return dict(
        w1=w1p,
        b1=folded["b1"].astype(jnp.bfloat16),
        w2=folded["w2"].astype(jnp.bfloat16), b2=folded["b2"].astype(jnp.bfloat16),
        w3=folded["w3"].astype(jnp.bfloat16), b3=folded["b3"].astype(jnp.bfloat16),
        w4_row=folded["w4"].reshape(1, HID),  b4=folded["b4"].reshape(1, 1),
    )


# ----------------------------------------------------------------------------
# References
# ----------------------------------------------------------------------------
def reference_unfolded_f32(x, r):
    """Module semantics: Linear -> eval-mode BN -> ReLU (all f32)."""
    def blk(h, w, b, g, be, m, v):
        h = h @ w + b
        h = (h - m) / jnp.sqrt(v + BN_EPS) * g + be
        return jnp.maximum(h, 0.0)
    h = blk(x, r["w1"], r["b1"], r["g1"], r["be1"], r["m1"], r["v1"])
    h = blk(h, r["w2"], r["b2"], r["g2"], r["be2"], r["m2"], r["v2"])
    h = blk(h, r["w3"], r["b3"], r["g3"], r["be3"], r["m3"], r["v3"])
    return h @ r["w4"] + r["b4"]


def reference_folded_f32(x, f):
    h = jnp.maximum(x @ f["w1"] + f["b1"], 0.0)
    h = jnp.maximum(h @ f["w2"] + f["b2"], 0.0)
    h = jnp.maximum(h @ f["w3"] + f["b3"], 0.0)
    return h @ f["w4"] + f["b4"]


def reference_kernel_style(x, kp):
    """Mirrors the kernel arithmetic (f32 layer-1, bf16 hidden epilogue)."""
    bf = jnp.bfloat16
    xp = jnp.pad(x, ((0, 0), (0, K_PAD - IN_DIM)))
    h = jnp.dot(xp, kp["w1"], preferred_element_type=jnp.float32,
                precision=jax.lax.Precision.HIGHEST)
    h = jnp.maximum(h.astype(bf) + kp["b1"], 0)
    h = jnp.dot(h, kp["w2"], preferred_element_type=jnp.float32)
    h = jnp.maximum(h.astype(bf) + kp["b2"], 0)
    h = jnp.dot(h, kp["w3"], preferred_element_type=jnp.float32)
    h = jnp.maximum(h.astype(bf) + kp["b3"], 0)
    y = jnp.sum(h.astype(jnp.float32) * kp["w4_row"], axis=-1, keepdims=True)
    return y + kp["b4"]


# ----------------------------------------------------------------------------
if __name__ == "__main__":
    key = jax.random.PRNGKey(0)
    kx, kp_key = jax.random.split(key)

    raw = make_raw_params(kp_key)
    folded = fold_bn(raw)
    kparams = to_kernel_params(folded)

    # Host-side check: BN folding is exact in f32 (module semantics preserved).
    x_chk = jax.random.normal(kx, (8, IN_DIM), jnp.float32)
    ref_unfolded = reference_unfolded_f32(x_chk, raw)
    ref_folded = reference_folded_f32(x_chk, folded)
    assert jnp.allclose(ref_folded, ref_unfolded, atol=1e-5, rtol=1e-5), "BN fold mismatch"

    # Kernel checks: tiny batch (single grid step) and a multi-step batch
    # (exercises the pipelined, TC-sharded path).
    for B in (8, 300):
        x = jax.random.normal(jax.random.fold_in(kx, B), (B, IN_DIM), jnp.float32)
        out = jax.block_until_ready(neural_net_forward(x, kparams))
        assert out.shape == (B, OUT_DIM), out.shape

        ref_k = reference_kernel_style(x, kparams)          # matching arithmetic
        ref_f = reference_folded_f32(x, folded)             # full-f32 module semantics
        assert jnp.allclose(out, ref_k, atol=2e-2, rtol=2e-2), f"kernel mismatch vs bf16-style ref (B={B})"
        assert jnp.allclose(out, ref_f, atol=5e-2, rtol=5e-2), f"kernel drift vs f32 module ref (B={B})"

    print("KERNEL_OK")
</pallas_src>

<mosaic_0001>
module attributes {stable_mosaic.version = 11 : i64} {
  func.func @mlp_kernel(%arg0: i32, %arg1: memref<16x128xf32, #tpu.memory_space<vmem>>, %arg2: memref<128x512xf32, #tpu.memory_space<vmem>>, %arg3: memref<1x512xbf16, #tpu.memory_space<vmem>>, %arg4: memref<512x512xbf16, #tpu.memory_space<vmem>>, %arg5: memref<1x512xbf16, #tpu.memory_space<vmem>>, %arg6: memref<512x512xbf16, #tpu.memory_space<vmem>>, %arg7: memref<1x512xbf16, #tpu.memory_space<vmem>>, %arg8: memref<1x512xf32, #tpu.memory_space<vmem>>, %arg9: memref<1x1xf32, #tpu.memory_space<vmem>>, %arg10: memref<16x1xf32, #tpu.memory_space<vmem>>) attributes {dimension_semantics = [#tpu.dimension_semantics<parallel>], iteration_bounds = array<i64: 1>, scalar_prefetch = 0 : i64, scratch_operands = 0 : i64, tpu.core_type = #tpu.core_type<tc>, window_params = [{transform_indices = @transform_0, window_bounds = array<i64: 16, 128>}, {pipeline_mode = #tpu.pipeline_mode<synchronous>, transform_indices = @transform_1, window_bounds = array<i64: 128, 512>}, {pipeline_mode = #tpu.pipeline_mode<synchronous>, transform_indices = @transform_2, window_bounds = array<i64: 1, 512>}, {pipeline_mode = #tpu.pipeline_mode<synchronous>, transform_indices = @transform_3, window_bounds = array<i64: 512, 512>}, {pipeline_mode = #tpu.pipeline_mode<synchronous>, transform_indices = @transform_4, window_bounds = array<i64: 1, 512>}, {pipeline_mode = #tpu.pipeline_mode<synchronous>, transform_indices = @transform_5, window_bounds = array<i64: 512, 512>}, {pipeline_mode = #tpu.pipeline_mode<synchronous>, transform_indices = @transform_6, window_bounds = array<i64: 1, 512>}, {pipeline_mode = #tpu.pipeline_mode<synchronous>, transform_indices = @transform_7, window_bounds = array<i64: 1, 512>}, {pipeline_mode = #tpu.pipeline_mode<synchronous>, transform_indices = @transform_8, window_bounds = array<i64: 1, 1>}, {transform_indices = @transform_9, window_bounds = array<i64: 16, 1>}]} {
    %c0 = arith.constant 0 : index
    %c0_0 = arith.constant 0 : index
    %0 = vector.load %arg1[%c0, %c0_0] : memref<16x128xf32, #tpu.memory_space<vmem>>, vector<16x128xf32>
    %c0_1 = arith.constant 0 : index
    %c0_2 = arith.constant 0 : index
    %1 = vector.load %arg2[%c0_1, %c0_2] : memref<128x512xf32, #tpu.memory_space<vmem>>, vector<128x512xf32>
    %cst = arith.constant dense<0.000000e+00> : vector<16x512xf32>
    %2 = tpu.matmul %0, %1, %cst {dimension_numbers = #tpu.dot_dimension_numbers<[1], [0], [0], [1], [0, 0, 1, 1], [], []>} : vector<16x128xf32>, vector<128x512xf32>, vector<16x512xf32> -> vector<16x512xf32>
    %3 = arith.truncf %2 : vector<16x512xf32> to vector<16x512xbf16>
    %c0_3 = arith.constant 0 : index
    %c0_4 = arith.constant 0 : index
    %4 = vector.load %arg3[%c0_3, %c0_4] : memref<1x512xbf16, #tpu.memory_space<vmem>>, vector<1x512xbf16>
    %5 = vector.broadcast %4 : vector<1x512xbf16> to vector<16x512xbf16>
    %6 = arith.addf %3, %5 : vector<16x512xbf16>
    %cst_5 = arith.constant 0.000000e+00 : bf16
    %7 = vector.broadcast %cst_5 : bf16 to vector<16x512xbf16>
    %8 = arith.maximumf %6, %7 : vector<16x512xbf16>
    %c0_6 = arith.constant 0 : index
    %c0_7 = arith.constant 0 : index
    %9 = vector.load %arg4[%c0_6, %c0_7] : memref<512x512xbf16, #tpu.memory_space<vmem>>, vector<512x512xbf16>
    %cst_8 = arith.constant dense<0.000000e+00> : vector<16x512xf32>
    %10 = tpu.matmul %8, %9, %cst_8 {dimension_numbers = #tpu.dot_dimension_numbers<[1], [0], [0], [1], [0, 0, 1, 1], [], []>} : vector<16x512xbf16>, vector<512x512xbf16>, vector<16x512xf32> -> vector<16x512xf32>
    %11 = arith.truncf %10 : vector<16x512xf32> to vector<16x512xbf16>
    %c0_9 = arith.constant 0 : index
    %c0_10 = arith.constant 0 : index
    %12 = vector.load %arg5[%c0_9, %c0_10] : memref<1x512xbf16, #tpu.memory_space<vmem>>, vector<1x512xbf16>
    %13 = vector.broadcast %12 : vector<1x512xbf16> to vector<16x512xbf16>
    %14 = arith.addf %11, %13 : vector<16x512xbf16>
    %cst_11 = arith.constant 0.000000e+00 : bf16
    %15 = vector.broadcast %cst_11 : bf16 to vector<16x512xbf16>
    %16 = arith.maximumf %14, %15 : vector<16x512xbf16>
    %c0_12 = arith.constant 0 : index
    %c0_13 = arith.constant 0 : index
    %17 = vector.load %arg6[%c0_12, %c0_13] : memref<512x512xbf16, #tpu.memory_space<vmem>>, vector<512x512xbf16>
    %cst_14 = arith.constant dense<0.000000e+00> : vector<16x512xf32>
    %18 = tpu.matmul %16, %17, %cst_14 {dimension_numbers = #tpu.dot_dimension_numbers<[1], [0], [0], [1], [0, 0, 1, 1], [], []>} : vector<16x512xbf16>, vector<512x512xbf16>, vector<16x512xf32> -> vector<16x512xf32>
    %19 = arith.truncf %18 : vector<16x512xf32> to vector<16x512xbf16>
    %c0_15 = arith.constant 0 : index
    %c0_16 = arith.constant 0 : index
    %20 = vector.load %arg7[%c0_15, %c0_16] : memref<1x512xbf16, #tpu.memory_space<vmem>>, vector<1x512xbf16>
    %21 = vector.broadcast %20 : vector<1x512xbf16> to vector<16x512xbf16>
    %22 = arith.addf %19, %21 : vector<16x512xbf16>
    %cst_17 = arith.constant 0.000000e+00 : bf16
    %23 = vector.broadcast %cst_17 : bf16 to vector<16x512xbf16>
    %24 = arith.maximumf %22, %23 : vector<16x512xbf16>
    %25 = arith.extf %24 : vector<16x512xbf16> to vector<16x512xf32>
    %c0_18 = arith.constant 0 : index
    %c0_19 = arith.constant 0 : index
    %26 = vector.load %arg8[%c0_18, %c0_19] : memref<1x512xf32, #tpu.memory_space<vmem>>, vector<1x512xf32>
    %27 = vector.broadcast %26 : vector<1x512xf32> to vector<16x512xf32>
    %28 = arith.mulf %25, %27 : vector<16x512xf32>
    %cst_20 = arith.constant dense<0.000000e+00> : vector<16xf32>
    %29 = vector.multi_reduction <add>, %28, %cst_20 [1] : vector<16x512xf32> to vector<16xf32>
    %30 = vector.shape_cast %29 : vector<16xf32> to vector<16x1xf32>
    %c0_21 = arith.constant 0 : index
    %c0_22 = arith.constant 0 : index
    %31 = vector.load %arg9[%c0_21, %c0_22] : memref<1x1xf32, #tpu.memory_space<vmem>>, vector<1x1xf32>
    %32 = vector.broadcast %31 : vector<1x1xf32> to vector<16x1xf32>
    %33 = arith.addf %30, %32 : vector<16x1xf32>
    %c0_23 = arith.constant 0 : index
    %c0_24 = arith.constant 0 : index
    %34 = vector.load %arg10[%c0_23, %c0_24] : memref<16x1xf32, #tpu.memory_space<vmem>>, vector<16x1xf32>
    tpu.vector_store %arg10[%c0_23, %c0_24], %33 {strides = array<i32>} : memref<16x1xf32, #tpu.memory_space<vmem>>, vector<16x1xf32>,
    return
  }
  func.func @transform_0(%arg0: i32) -> (i32, i32) {
    %c0_i32 = arith.constant 0 : i32
    %c0_i32_0 = arith.constant 0 : i32
    return %arg0, %c0_i32 : i32, i32
  }
  func.func @transform_1(%arg0: i32) -> (i32, i32) {
    %c0_i32 = arith.constant 0 : i32
    %c0_i32_0 = arith.constant 0 : i32
    %c0_i32_1 = arith.constant 0 : i32
    return %c0_i32, %c0_i32_0 : i32, i32
  }
  func.func @transform_2(%arg0: i32) -> (i32, i32) {
    %c0_i32 = arith.constant 0 : i32
    %c0_i32_0 = arith.constant 0 : i32
    %c0_i32_1 = arith.constant 0 : i32
    return %c0_i32, %c0_i32_0 : i32, i32
  }
  func.func @transform_3(%arg0: i32) -> (i32, i32) {
    %c0_i32 = arith.constant 0 : i32
    %c0_i32_0 = arith.constant 0 : i32
    %c0_i32_1 = arith.constant 0 : i32
    return %c0_i32, %c0_i32_0 : i32, i32
  }
  func.func @transform_4(%arg0: i32) -> (i32, i32) {
    %c0_i32 = arith.constant 0 : i32
    %c0_i32_0 = arith.constant 0 : i32
    %c0_i32_1 = arith.constant 0 : i32
    return %c0_i32, %c0_i32_0 : i32, i32
  }
  func.func @transform_5(%arg0: i32) -> (i32, i32) {
    %c0_i32 = arith.constant 0 : i32
    %c0_i32_0 = arith.constant 0 : i32
    %c0_i32_1 = arith.constant 0 : i32
    return %c0_i32, %c0_i32_0 : i32, i32
  }
  func.func @transform_6(%arg0: i32) -> (i32, i32) {
    %c0_i32 = arith.constant 0 : i32
    %c0_i32_0 = arith.constant 0 : i32
    %c0_i32_1 = arith.constant 0 : i32
    return %c0_i32, %c0_i32_0 : i32, i32
  }
  func.func @transform_7(%arg0: i32) -> (i32, i32) {
    %c0_i32 = arith.constant 0 : i32
    %c0_i32_0 = arith.constant 0 : i32
    %c0_i32_1 = arith.constant 0 : i32
    return %c0_i32, %c0_i32_0 : i32, i32
  }
  func.func @transform_8(%arg0: i32) -> (i32, i32) {
    %c0_i32 = arith.constant 0 : i32
    %c0_i32_0 = arith.constant 0 : i32
    %c0_i32_1 = arith.constant 0 : i32
    return %c0_i32, %c0_i32_0 : i32, i32
  }
  func.func @transform_9(%arg0: i32) -> (i32, i32) {
    %c0_i32 = arith.constant 0 : i32
    %c0_i32_0 = arith.constant 0 : i32
    return %arg0, %c0_i32 : i32, i32
  }
}

</mosaic_0001>

<bundles_post_ra>
// kernel: tpu_custom_call.1
= control target key start
LH: loop header
LB: loop body
LE: loop exit
PB: predicated region body
PF: predicated region fallthrough
CT: control target
= control target key end

     0   :  { %s3494_s0 = inlined_call_operand.hbm [shape: f32[16,128], index: 0, kind: input, shape index: {}]   ;;  %s3495_s1 = inlined_call_operand.hbm [shape: f32[128,512], index: 1, kind: input, shape index: {}]   ;;  %s3496_s2 = inlined_call_operand.vmem [shape: bf16[1,512], index: 2, kind: input, shape index: {}]   ;;  %s3497_s3 = inlined_call_operand.hbm [shape: bf16[512,512], index: 3, kind: input, shape index: {}]   ;;  %s3498_s4 = inlined_call_operand.vmem [shape: bf16[1,512], index: 4, kind: input, shape index: {}]   ;;  %s3499_s5 = inlined_call_operand.hbm [shape: bf16[512,512], index: 5, kind: input, shape index: {}]   ;;  %s3500_s6 = inlined_call_operand.vmem [shape: bf16[1,512], index: 6, kind: input, shape index: {}]   ;;  %s3501_s7 = inlined_call_operand.vmem [shape: f32[1,512], index: 7, kind: input, shape index: {}]   ;;  %s3502_s8 = inlined_call_operand.<no memory space> [shape: f32[1,1], index: 8, kind: input, shape index: {}]   ;;  %s3503_s9 = inlined_call_operand.vmem [shape: f32[16,1], index: 9, kind: output, shape index: {}]  }
   0x1   :  { %v14_v0 = vstv %s3502_s8 }
   0x2   :  { %15 = vst [vmem:[#allocation2] sm:$0x1] %v14_v0 }
   0x3   :  { %16 = vsyncpa [#allocation4], 0 }
   0x4   :  { %17 = vsyncpa [#allocation6], 0 }
   0x5   :  { %18 = vsyncpa [#allocation9], 0  ;;  %s3286_s11 = smov [#allocation5]   ;;  %s3192_s15 = scalar_lea.hbm %s3495_s1, 8192 }
   0x6   :  { %s36_s12 = sshll.u32 %s3286_s11, 4  ;;  %p3193_p0 = scmp.ne.s32.totalorder %s3495_s1, %s3192_s15  ;;  %s37_s12 = int_to_ptr.vmem [resolvable:$true] %s36_s12 }
   0x7   :  { %p3196_p1 = scmp.lt.u32.totalorder %s3192_s15, %s3495_s1 }
   0x9   :  { %p3198_p2 = pnand %p3196_p1, %p3193_p0 }
   0xb   :  { %3201 = shalt.err (!%p3198_p2)
}
   0xc   :  { %s3202_s8 = scalar_lea.vmem %s37_s12, 8192  ;;  %p3207_p4 = scmp.lt.s32.totalorder %s37_s12, %s37_s12 }
   0xd   :  { %p3203_p3 = scmp.ne.s32.totalorder %s37_s12, %s3202_s8  ;;  %p3208_p5 = scmp.lt.s32.totalorder %s3202_s8, %s3202_s8 }
   0xf   :  { %p3209_p6 = por %p3208_p5, %p3207_p4 }
  0x11   :  { %p3210_p7 = pnand %p3209_p6, %p3203_p3 }
  0x13   :  { %3213 = shalt.err (!%p3210_p7)
}
  0x14   :  { %s3287_s20 = smov 512   ;;  %s3288_s21 = smov 32  }
  0x15   :  { %42 = dma.hbm_to_vmem [thread:$0]  %s3495_s1, 8192, %s37_s12, [#allocation6], %s3287_s20, %s3287_s20, %s3288_s21  }
  0x16   :  { %s3289_s24 = smov [#allocation3]   ;;  %s3214_s28 = scalar_lea.hbm %s3494_s0, 256 }
  0x17   :  { %s24_s25 = sshll.u32 %s3289_s24, 4  ;;  %p3215_p8 = scmp.ne.s32.totalorder %s3494_s0, %s3214_s28  ;;  %s25_s25 = int_to_ptr.vmem [resolvable:$true] %s24_s25 }
  0x18   :  { %p3218_p9 = scmp.lt.u32.totalorder %s3214_s28, %s3494_s0 }
  0x1a   :  { %p3220_p10 = pnand %p3218_p9, %p3215_p8 }
  0x1c   :  { %3223 = shalt.err (!%p3220_p10)
}
  0x1d   :  { %s3224_s13 = scalar_lea.vmem %s25_s25, 256  ;;  %p3229_p12 = scmp.lt.s32.totalorder %s25_s25, %s25_s25 }
  0x1e   :  { %p3225_p11 = scmp.ne.s32.totalorder %s25_s25, %s3224_s13  ;;  %p3230_p13 = scmp.lt.s32.totalorder %s3224_s13, %s3224_s13 }
  0x20   :  { %p3231_p0 = por %p3230_p13, %p3229_p12 }
  0x22   :  { %p3232_p1 = pnand %p3231_p0, %p3225_p11 }
  0x24   :  { %3235 = shalt.err (!%p3232_p1)
}
  0x25   :  { %s3290_s1 = smov 128   ;;  %s3291_s12 = smov 8  }
  0x26   :  { %30 = dma.hbm_to_vmem [thread:$0]  %s3494_s0, 256, %s25_s25, [#allocation4], %s3290_s1, %s3290_s1, %s3291_s12  }
  0x27   :  { %s3292_s16 = smov [#allocation7]   ;;  %s3236_s8 = scalar_lea.hbm %s3497_s3, 16384 }
  0x28   :  { %s50_s17 = sshll.u32 %s3292_s16, 4  ;;  %p3237_p2 = scmp.ne.s32.totalorder %s3497_s3, %s3236_s8  ;;  %s51_s17 = int_to_ptr.vmem [resolvable:$true] %s50_s17 }
  0x29   :  { %p3240_p3 = scmp.lt.u32.totalorder %s3236_s8, %s3497_s3 }
  0x2b   :  { %p3242_p4 = pnand %p3240_p3, %p3237_p2 }
  0x2d   :  { %3245 = shalt.err (!%p3242_p4)
}
  0x2e   :  { %s3246_s24 = scalar_lea.vmem %s51_s17, 16384  ;;  %p3251_p6 = scmp.lt.s32.totalorder %s51_s17, %s51_s17 }
  0x2f   :  { %p3247_p5 = scmp.ne.s32.totalorder %s51_s17, %s3246_s24  ;;  %p3252_p7 = scmp.lt.s32.totalorder %s3246_s24, %s3246_s24 }
  0x31   :  { %p3253_p8 = por %p3252_p7, %p3251_p6 }
  0x33   :  { %p3254_p9 = pnand %p3253_p8, %p3247_p5 }
  0x35   :  { %3257 = shalt.err (!%p3254_p9)
}
  0x36   :  { %s3293_s0 = smov 256   ;;  %s3294_s25 = smov 16  }
  0x37   :  { %56 = dma.hbm_to_vmem [thread:$0]  %s3497_s3, 16384, %s51_s17, [#allocation6], %s3293_s0, %s3293_s0, %s3294_s25  }
  0x38   :  { %s3295_s28 = smov [#allocation8]   ;;  %s3258_s11 = scalar_lea.hbm %s3499_s5, 16384 }
  0x39   :  { %s64_s29 = sshll.u32 %s3295_s28, 4  ;;  %p3259_p10 = scmp.ne.s32.totalorder %s3499_s5, %s3258_s11  ;;  %s65_s29 = int_to_ptr.vmem [resolvable:$true] %s64_s29 }
  0x3a   :  { %p3262_p11 = scmp.lt.u32.totalorder %s3258_s11, %s3499_s5 }
  0x3c   :  { %p3264_p12 = pnand %p3262_p11, %p3259_p10 }
  0x3e   :  { %3267 = shalt.err (!%p3264_p12)
}
  0x3f   :  { %s3268_s15 = scalar_lea.vmem %s65_s29, 16384  ;;  %p3273_p0 = scmp.lt.s32.totalorder %s65_s29, %s65_s29 }
  0x40   :  { %p3269_p13 = scmp.ne.s32.totalorder %s65_s29, %s3268_s15  ;;  %p3274_p1 = scmp.lt.s32.totalorder %s3268_s15, %s3268_s15 }
  0x42   :  { %p3275_p2 = por %p3274_p1, %p3273_p0 }
  0x44   :  { %p3276_p3 = pnand %p3275_p2, %p3269_p13 }
  0x46   :  { %3279 = shalt.err (!%p3276_p3)
}
  0x47   :  { %70 = dma.hbm_to_vmem [thread:$0]  %s3499_s5, 16384, %s65_s29, [#allocation9], %s3293_s0, %s3293_s0, %s3294_s25  }
  0x48   :  { %3280 = dma.done.wait [#allocation4], 256  }
  0x49   :  { %3281 = vsyncadd [#allocation4], 4294967040 }
  0x4a   :  { %3282 = dma.done.wait [#allocation6], 24576  }
  0x4b   :  { %3283 = vsyncadd [#allocation6], 4294942720 }
  0x4c   :  { %3284 = dma.done.wait [#allocation9], 16384  }
  0x4d   :  { %3285 = vsyncadd [#allocation9], 4294950912  ;;  %v3296_v1 = vmov 0.0   ;;  %v93_v2 = vld [vmem:[#allocation5 + $0x8] sm:$0xff]  ;;  %v92_v4 = vld [vmem:[#allocation5] sm:$0xff]  ;;  %vm2445_vm0 = vcmask 7168  }
  0x4e   :  { %220 = vmatprep.mubr.f32.mxu0 %v3296_v1  ;;  %297 = vmatprep.mubr.f32.mxu1 %v3296_v1  ;;  %v97_v3 = vld [vmem:[#allocation5 + $0x28] sm:$0xff]  ;;  %v96_v6 = vld [vmem:[#allocation5 + $0x20] sm:$0xff]  ;;  %v95_v29 = vld [vmem:[#allocation5 + $0x18] sm:$0xff] }
  0x4f   :  { %v2715_v5 = vpack.c.bf16 %v97_v3, %v93_v2  ;;  %v101_v7 = vld [vmem:[#allocation5 + $0x48] sm:$0xff]  ;;  %v2717_v9 = vpack.c.bf16 %v96_v6, %v92_v4  ;;  %v100_v11 = vld [vmem:[#allocation5 + $0x40] sm:$0xff]  ;;  %v99_v30 = vld [vmem:[#allocation5 + $0x38] sm:$0xff] }
  0x50   :  { %v105_v8 = vld [vmem:[#allocation5 + $0x68] sm:$0xff]  ;;  %v104_v12 = vld [vmem:[#allocation5 + $0x60] sm:$0xff]  ;;  %v2747_v33 = vpack.c.bf16 %v99_v30, %v95_v29  ;;  %v94_v34 = vld [vmem:[#allocation5 + $0x10] sm:$0xff] }
  0x51   :  { %v2719_v10 = vpack.c.bf16 %v105_v8, %v101_v7  ;;  %v109_v13 = vld [vmem:[#allocation5 + $0x88] sm:$0xff]  ;;  %2716 = vmatprep.subr.bf16.mxu0 %v2715_v5  ;;  %v2721_v15 = vpack.c.bf16 %v104_v12, %v100_v11  ;;  %v108_v17 = vld [vmem:[#allocation5 + $0x80] sm:$0xff]  ;;  %v98_v35 = vld [vmem:[#allocation5 + $0x30] sm:$0xff] }
  0x52   :  { %v113_v14 = vld [vmem:[#allocation5 + $0xa8] sm:$0xff]  ;;  %2718 = vmatpush1.bf16.msra.mxu0 %v2717_v9  ;;  %v112_v18 = vld [vmem:[#allocation5 + $0xa0] sm:$0xff]  ;;  %v103_v36 = vld [vmem:[#allocation5 + $0x58] sm:$0xff]  ;;  %v2749_v38 = vpack.c.bf16 %v98_v35, %v94_v34  ;;  %2748 = vmatprep.subr.bf16.mxu1 %v2747_v33 }
  0x53   :  { %2720 = vmatprep.subr.bf16.mxu0 %v2719_v10  ;;  %v2723_v16 = vpack.c.bf16 %v113_v14, %v109_v13  ;;  %v117_v19 = vld [vmem:[#allocation5 + $0xc8] sm:$0xff]  ;;  %v2725_v21 = vpack.c.bf16 %v112_v18, %v108_v17  ;;  %v116_v23 = vld [vmem:[#allocation5 + $0xc0] sm:$0xff]  ;;  %v107_v39 = vld [vmem:[#allocation5 + $0x78] sm:$0xff] }
  0x54   :  { %v121_v20 = vld [vmem:[#allocation5 + $0xe8] sm:$0xff]  ;;  %v120_v24 = vld [vmem:[#allocation5 + $0xe0] sm:$0xff]  ;;  %v102_v40 = vld [vmem:[#allocation5 + $0x50] sm:$0xff]  ;;  %v2751_v43 = vpack.c.bf16 %v107_v39, %v103_v36  ;;  %2750 = vmatpush1.bf16.msra.mxu1 %v2749_v38 }
  0x55   :  { %v2727_v22 = vpack.c.bf16 %v121_v20, %v117_v19  ;;  %v125_v25 = vld [vmem:[#allocation5 + $0x108] sm:$0xff]  ;;  %v124_v27 = vld [vmem:[#allocation5 + $0x100] sm:$0xff]  ;;  %v2729_v31 = vpack.c.bf16 %v120_v24, %v116_v23  ;;  %v106_v41 = vld [vmem:[#allocation5 + $0x70] sm:$0xff] }
  0x56   :  { %2722 = vmatpush1.bf16.msra.mxu0 %v2721_v15  ;;  %v129_v26 = vld [vmem:[#allocation5 + $0x128] sm:$0xff]  ;;  %v128_v28 = vld [vmem:[#allocation5 + $0x120] sm:$0xff]  ;;  %v111_v44 = vld [vmem:[#allocation5 + $0x98] sm:$0xff]  ;;  %v2753_v46 = vpack.c.bf16 %v106_v41, %v102_v40  ;;  %2752 = vmatprep.subr.bf16.mxu1 %v2751_v43 }
  0x57   :  { %2724 = vmatprep.subr.bf16.mxu0 %v2723_v16  ;;  %v133_v32 = vld [vmem:[#allocation5 + $0x148] sm:$0xff]  ;;  %v2731_v37 = vpack.c.bf16 %v129_v26, %v125_v25  ;;  %v115_v45 = vld [vmem:[#allocation5 + $0xb8] sm:$0xff]  ;;  %v2733_v47 = vpack.c.bf16 %v128_v28, %v124_v27  ;;  %v132_v48 = vld [vmem:[#allocation5 + $0x140] sm:$0xff] }
  0x58   :  { %v137_v42 = vld [vmem:[#allocation5 + $0x168] sm:$0xff]  ;;  %v2755_v49 = vpack.c.bf16 %v115_v45, %v111_v44  ;;  %v110_v50 = vld [vmem:[#allocation5 + $0x90] sm:$0xff]  ;;  %v136_v53 = vld [vmem:[#allocation5 + $0x160] sm:$0xff]  ;;  %2754 = vmatpush1.bf16.msra.mxu1 %v2753_v46 }
  0x59   :  { %v114_v51 = vld [vmem:[#allocation5 + $0xb0] sm:$0xff]  ;;  %v2735_v52 = vpack.c.bf16 %v137_v42, %v133_v32  ;;  %v119_v54 = vld [vmem:[#allocation5 + $0xd8] sm:$0xff]  ;;  %v141_v56 = vld [vmem:[#allocation5 + $0x188] sm:$0xff]  ;;  %v2737_v60 = vpack.c.bf16 %v136_v53, %v132_v48 }
  0x5a   :  { %2726 = vmatpush1.bf16.msra.mxu0 %v2725_v21  ;;  %v123_v55 = vld [vmem:[#allocation5 + $0xf8] sm:$0xff]  ;;  %v145_v57 = vld [vmem:[#allocation5 + $0x1a8] sm:$0xff]  ;;  %v140_v58 = vld [vmem:[#allocation5 + $0x180] sm:$0xff]  ;;  %v2757_v59 = vpack.c.bf16 %v114_v51, %v110_v50  ;;  %2756 = vmatprep.subr.bf16.mxu1 %v2755_v49 }
  0x5b   :  { %2728 = vmatprep.subr.bf16.mxu0 %v2727_v22  ;;  %v144_v61 = vld [vmem:[#allocation5 + $0x1a0] sm:$0xff]  ;;  %v2759_v62 = vpack.c.bf16 %v123_v55, %v119_v54  ;;  %v118_v63 = vld [vmem:[#allocation5 + $0xd0] sm:$0xff]  ;;  %v2739_v2 = vpack.c.bf16 %v145_v57, %v141_v56  ;;  %v149_v3 = vld [vmem:[#allocation5 + $0x1c8] sm:$0xff] }
  0x5c   :  { %v122_v0 = vld [vmem:[#allocation5 + $0xf0] sm:$0xff]  ;;  %v127_v4 = vld [vmem:[#allocation5 + $0x118] sm:$0xff]  ;;  %v153_v6 = vld [vmem:[#allocation5 + $0x1e8] sm:$0xff]  ;;  %2758 = vmatpush1.bf16.msra.mxu1 %v2757_v59  ;;  %v2741_v10 = vpack.c.bf16 %v144_v61, %v140_v58 }
  0x5d   :  { %v131_v5 = vld [vmem:[#allocation5 + $0x138] sm:$0xff]  ;;  %v148_v7 = vld [vmem:[#allocation5 + $0x1c0] sm:$0xff]  ;;  %v2761_v9 = vpack.c.bf16 %v122_v0, %v118_v63  ;;  %2760 = vmatprep.subr.bf16.mxu1 %v2759_v62  ;;  %v126_v12 = vld [vmem:[#allocation5 + $0x110] sm:$0xff]  ;;  %v2743_v14 = vpack.c.bf16 %v153_v6, %v149_v3 }
  0x5e   :  { %2730 = vmatpush1.bf16.msra.mxu0 %v2729_v31  ;;  %v152_v8 = vld [vmem:[#allocation5 + $0x1e0] sm:$0xff]  ;;  %v2763_v11 = vpack.c.bf16 %v131_v5, %v127_v4  ;;  %v130_v13 = vld [vmem:[#allocation5 + $0x130] sm:$0xff]  ;;  %v135_v15 = vld [vmem:[#allocation5 + $0x158] sm:$0xff] }
  0x5f   :  { %2732 = vmatprep.subr.bf16.mxu0 %v2731_v37  ;;  %v139_v16 = vld [vmem:[#allocation5 + $0x178] sm:$0xff]  ;;  %v2765_v17 = vpack.c.bf16 %v130_v13, %v126_v12  ;;  %v134_v18 = vld [vmem:[#allocation5 + $0x150] sm:$0xff]  ;;  %v2745_v19 = vpack.c.bf16 %v152_v8, %v148_v7 }
  0x60   :  { %2762 = vmatpush1.bf16.msra.mxu1 %v2761_v9  ;;  %v2767_v20 = vpack.c.bf16 %v139_v16, %v135_v15  ;;  %v138_v21 = vld [vmem:[#allocation5 + $0x170] sm:$0xff]  ;;  %v143_v22 = vld [vmem:[#allocation5 + $0x198] sm:$0xff] }
  0x61   :  { %2764 = vmatprep.subr.bf16.mxu1 %v2763_v11  ;;  %v147_v23 = vld [vmem:[#allocation5 + $0x1b8] sm:$0xff]  ;;  %v2810_v24 = vld [vmem:[#allocation7 + $0x4] ss:$16 sps:$4 sm:$0xff]   ;;  %v2769_v26 = vpack.c.bf16 %v138_v21, %v134_v18  ;;  %v2808_v32 = vld [vmem:[#allocation7] ss:$16 sps:$4 sm:$0xff]  }
  0x62   :  { %2734 = vmatpush1.bf16.msra.mxu0 %v2733_v47  ;;  %v90_v25 = vld [vmem:[#allocation3] sm:$0xff]  ;;  %v2771_v28 = vpack.c.bf16 %v147_v23, %v143_v22  ;;  %v151_v30 = vld [vmem:[#allocation5 + $0x1d8] sm:$0xff] }
  0x63   :  { %2736 = vmatprep.subr.bf16.mxu0 %v2735_v52  ;;  %v142_v27 = vld [vmem:[#allocation5 + $0x190] sm:$0xff]  ;;  %v155_v31 = vld [vmem:[#allocation5 + $0x1f8] sm:$0xff] }
  0x64   :  { %2766 = vmatpush1.bf16.msra.mxu1 %v2765_v17  ;;  %v146_v29 = vld [vmem:[#allocation5 + $0x1b0] sm:$0xff]  ;;  %v91_v34 = vld [vmem:[#allocation3 + $0x8] sm:$0xff]  ;;  %v2775_v36 = vpack.c.bf16 %v155_v31, %v151_v30 }
  0x65   :  { %2768 = vmatprep.subr.bf16.mxu1 %v2767_v20  ;;  %v2816_v33 = vld [vmem:[#allocation7 + $0x24] ss:$16 sps:$4 sm:$0xff]   ;;  %v2773_v35 = vpack.c.bf16 %v146_v29, %v142_v27  ;;  %v2814_v39 = vld [vmem:[#allocation7 + $0x20] ss:$16 sps:$4 sm:$0xff]   ;;  %v2813_v42 = vld [vmem:[#allocation7 + $0xc] ss:$16 sps:$4 sm:$0xff]  }
  0x66   :  { %2738 = vmatpush1.bf16.msra.mxu0 %v2737_v60  ;;  %v150_v37 = vld [vmem:[#allocation5 + $0x1d0] sm:$0xff]  ;;  %v2811_v45 = vld [vmem:[#allocation7 + $0x8] ss:$16 sps:$4 sm:$0xff]   ;;  %v2819_v46 = vld [vmem:[#allocation7 + $0x2c] ss:$16 sps:$4 sm:$0xff]  }
  0x67   :  { %2740 = vmatprep.subr.bf16.mxu0 %v2739_v2  ;;  %v154_v38 = vld [vmem:[#allocation5 + $0x1f0] sm:$0xff]  ;;  %v2817_v49 = vld [vmem:[#allocation7 + $0x28] ss:$16 sps:$4 sm:$0xff]   ;;  %v2825_v50 = vld [vmem:[#allocation7 + $0x4c] ss:$16 sps:$4 sm:$0xff]  }
  0x68   :  { %2770 = vmatpush1.bf16.msra.mxu1 %v2769_v26  ;;  %v2822_v40 = vld [vmem:[#allocation7 + $0x44] ss:$16 sps:$4 sm:$0xff]   ;;  %v2777_v41 = vpack.c.bf16 %v154_v38, %v150_v37  ;;  %v2820_v43 = vld [vmem:[#allocation7 + $0x40] ss:$16 sps:$4 sm:$0xff]   ;;  %v2823_v53 = vld [vmem:[#allocation7 + $0x48] ss:$16 sps:$4 sm:$0xff]  }
  0x69   :  { %2772 = vmatprep.subr.bf16.mxu1 %v2771_v28  ;;  %v2828_v44 = vld [vmem:[#allocation7 + $0x64] ss:$16 sps:$4 sm:$0xff]   ;;  %v2826_v47 = vld [vmem:[#allocation7 + $0x60] ss:$16 sps:$4 sm:$0xff]   ;;  %v2831_v54 = vld [vmem:[#allocation7 + $0x6c] ss:$16 sps:$4 sm:$0xff]  }
  0x6a   :  { %2742 = vmatpush1.bf16.msra.mxu0 %v2741_v10  ;;  %v2834_v48 = vld [vmem:[#allocation7 + $0x84] ss:$16 sps:$4 sm:$0xff]   ;;  %v2832_v51 = vld [vmem:[#allocation7 + $0x80] ss:$16 sps:$4 sm:$0xff]   ;;  %v2829_v55 = vld [vmem:[#allocation7 + $0x68] ss:$16 sps:$4 sm:$0xff]  }
  0x6b   :  { %2744 = vmatprep.subr.bf16.mxu0 %v2743_v14  ;;  %v2840_v52 = vld [vmem:[#allocation7 + $0xa4] ss:$16 sps:$4 sm:$0xff]   ;;  %v2838_v56 = vld [vmem:[#allocation7 + $0xa0] ss:$16 sps:$4 sm:$0xff]   ;;  %v2835_v60 = vld [vmem:[#allocation7 + $0x88] ss:$16 sps:$4 sm:$0xff]  }
  0x6c   :  { %2774 = vmatpush1.bf16.msra.mxu1 %v2773_v35  ;;  %v2846_v57 = vld [vmem:[#allocation7 + $0xc4] ss:$16 sps:$4 sm:$0xff]   ;;  %v2844_v58 = vld [vmem:[#allocation7 + $0xc0] ss:$16 sps:$4 sm:$0xff]   ;;  %v2843_v61 = vld [vmem:[#allocation7 + $0xac] ss:$16 sps:$4 sm:$0xff]  }
  0x6d   :  { %2776 = vmatprep.subr.bf16.mxu1 %v2775_v36  ;;  %v2852_v59 = vld [vmem:[#allocation7 + $0xe4] ss:$16 sps:$4 sm:$0xff]   ;;  %v2850_v62 = vld [vmem:[#allocation7 + $0xe0] ss:$16 sps:$4 sm:$0xff]   ;;  %v2841_v0 = vld [vmem:[#allocation7 + $0xa8] ss:$16 sps:$4 sm:$0xff]  }
  0x6e   :  { %2746 = vmatpush1.bf16.msra.mxu0 %v2745_v19  ;;  %v2858_v63 = vld [vmem:[#allocation7 + $0x104] ss:$16 sps:$4 sm:$0xff]   ;;  %v2849_v2 = vld [vmem:[#allocation7 + $0xcc] ss:$16 sps:$4 sm:$0xff]   ;;  %v2856_v3 = vld [vmem:[#allocation7 + $0x100] ss:$16 sps:$4 sm:$0xff]  }
  0x6f   :  { %1144 = vmatprep.subr.bf16.mxu0 %v2810_v24  ;;  %v2864_v4 = vld [vmem:[#allocation7 + $0x124] ss:$16 sps:$4 sm:$0xff]   ;;  %v2847_v5 = vld [vmem:[#allocation7 + $0xc8] ss:$16 sps:$4 sm:$0xff]   ;;  %v2855_v6 = vld [vmem:[#allocation7 + $0xec] ss:$16 sps:$4 sm:$0xff]  }
  0x70   :  { %2778 = vmatpush1.bf16.msra.mxu1 %v2777_v41  ;;  %v2862_v7 = vld [vmem:[#allocation7 + $0x120] ss:$16 sps:$4 sm:$0xff]   ;;  %v2870_v8 = vld [vmem:[#allocation7 + $0x144] ss:$16 sps:$4 sm:$0xff]   ;;  %v2853_v9 = vld [vmem:[#allocation7 + $0xe8] ss:$16 sps:$4 sm:$0xff]   ;;  %v327_v41 = vlaneseq }
  0x71   :  { %221 = vmatmul.mubr.f32.vlgmr.msra.gmra.mrb[0].mxu0 %v90_v25  ;;  %1230 = vmatprep.subr.bf16.mxu1 %v2813_v42  ;;  %v2861_v10 = vld [vmem:[#allocation7 + $0x10c] ss:$16 sps:$4 sm:$0xff]   ;;  %v2868_v11 = vld [vmem:[#allocation7 + $0x140] ss:$16 sps:$4 sm:$0xff]   ;;  %v2876_v12 = vld [vmem:[#allocation7 + $0x164] ss:$16 sps:$4 sm:$0xff]  }
  0x72   :  { %226 = vmatprep.mubr.f32.mxu0 %v3296_v1  ;;  %1145 = vmatpush1.bf16.msra.mxu0 %v2808_v32  ;;  %v2859_v13 = vld [vmem:[#allocation7 + $0x108] ss:$16 sps:$4 sm:$0xff]   ;;  %v2867_v14 = vld [vmem:[#allocation7 + $0x12c] ss:$16 sps:$4 sm:$0xff]   ;;  %v2874_v15 = vld [vmem:[#allocation7 + $0x160] ss:$16 sps:$4 sm:$0xff]  }
  0x73   :  { %1146 = vmatprep.subr.bf16.mxu0 %v2816_v33  ;;  %298 = vmatmul.mubr.f32.vlgmr.msra.gmra.mrb[0].mxu1 %v90_v25  ;;  %v2882_v16 = vld [vmem:[#allocation7 + $0x184] ss:$16 sps:$4 sm:$0xff]   ;;  %v2865_v17 = vld [vmem:[#allocation7 + $0x128] ss:$16 sps:$4 sm:$0xff]   ;;  %v2873_v18 = vld [vmem:[#allocation7 + $0x14c] ss:$16 sps:$4 sm:$0xff]  }
  0x74   :  { %303 = vmatprep.mubr.f32.mxu1 %v3296_v1  ;;  %1231 = vmatpush1.bf16.msra.mxu1 %v2811_v45  ;;  %v2837_v1 = vld [vmem:[#allocation7 + $0x8c] ss:$16 sps:$4 sm:$0xff]   ;;  %v2880_v19 = vld [vmem:[#allocation7 + $0x180] ss:$16 sps:$4 sm:$0xff]   ;;  %v2871_v20 = vld [vmem:[#allocation7 + $0x148] ss:$16 sps:$4 sm:$0xff]  }
  0x75   :  { %227 = vmatmul.mubr.f32.gmra.mrb[2].mxu0 %v91_v34  ;;  %1232 = vmatprep.subr.bf16.mxu1 %v2819_v46  ;;  %v2879_v21 = vld [vmem:[#allocation7 + $0x16c] ss:$16 sps:$4 sm:$0xff]   ;;  %v2877_v22 = vld [vmem:[#allocation7 + $0x168] ss:$16 sps:$4 sm:$0xff]   ;;  %v2888_v25 = vld [vmem:[#allocation7 + $0x1a4] ss:$16 sps:$4 sm:$0xff]  }
  0x76   :  { %1147 = vmatpush1.bf16.msra.mxu0 %v2814_v39  ;;  %v2885_v23 = vld [vmem:[#allocation7 + $0x18c] ss:$16 sps:$4 sm:$0xff]   ;;  %v2883_v24 = vld [vmem:[#allocation7 + $0x188] ss:$16 sps:$4 sm:$0xff]   ;;  %v2886_v27 = vld [vmem:[#allocation7 + $0x1a0] ss:$16 sps:$4 sm:$0xff]  }
  0x77   :  { %1148 = vmatprep.subr.bf16.mxu0 %v2822_v40  ;;  %304 = vmatmul.mubr.f32.gmra.mrb[2].mxu1 %v91_v34  ;;  %v2891_v26 = vld [vmem:[#allocation7 + $0x1ac] ss:$16 sps:$4 sm:$0xff]   ;;  %v2889_v28 = vld [vmem:[#allocation7 + $0x1a8] ss:$16 sps:$4 sm:$0xff]   ;;  %v2894_v29 = vld [vmem:[#allocation7 + $0x1c4] ss:$16 sps:$4 sm:$0xff]  }
  0x78   :  { %1233 = vmatpush1.bf16.msra.mxu1 %v2817_v49  ;;  %v2897_v30 = vld [vmem:[#allocation7 + $0x1cc] ss:$16 sps:$4 sm:$0xff]   ;;  %v2892_v31 = vld [vmem:[#allocation7 + $0x1c0] ss:$16 sps:$4 sm:$0xff]   ;;  %v2895_v32 = vld [vmem:[#allocation7 + $0x1c8] ss:$16 sps:$4 sm:$0xff]  }
  0x79   :  { %1234 = vmatprep.subr.bf16.mxu1 %v2825_v50  ;;  %v2900_v33 = vld [vmem:[#allocation7 + $0x1e4] ss:$16 sps:$4 sm:$0xff]   ;;  %v2903_v34 = vld [vmem:[#allocation7 + $0x1ec] ss:$16 sps:$4 sm:$0xff]   ;;  %v2898_v35 = vld [vmem:[#allocation7 + $0x1e0] ss:$16 sps:$4 sm:$0xff]  }
  0x7a   :  { %1149 = vmatpush1.bf16.msra.mxu0 %v2820_v43  ;;  %v2901_v36 = vld [vmem:[#allocation7 + $0x1e8] ss:$16 sps:$4 sm:$0xff]   ;;  %v2906_v37 = vld [vmem:[#allocation7 + $0x204] ss:$16 sps:$4 sm:$0xff]   ;;  %v2909_v38 = vld [vmem:[#allocation7 + $0x20c] ss:$16 sps:$4 sm:$0xff]  }
  0x7b   :  { %1150 = vmatprep.subr.bf16.mxu0 %v2828_v44  ;;  %v3297_v39 = vmov 1966171168   ;;  %v3404_v43 = vshrl.u32 %v327_v41, 7  ;;  %v2949_v41 = vld [vmem:[#allocation7 + $0x2e8] ss:$16 sps:$4 sm:$0xff]  }
  0x7c   :  { %1235 = vmatpush1.bf16.msra.mxu1 %v2823_v53  ;;  %v325_v40 = vunpack.c.l.s4 %v3297_v39  ;;  %v2455_v44 = vld.sshfl [vmem:[%s3496_s2] sm:$0x33 pattern:$0x75316420] }
  0x7d   :  { %1236 = vmatprep.subr.bf16.mxu1 %v2831_v54  ;;  %v323_v46 = vcombine.high %v2455_v44, %v2455_v44  ;;  %v3419_v50 = vsub.s32 0, %v3404_v43  ;;  %v2951_v39 = vld [vmem:[#allocation7 + $0x2ec] ss:$16 sps:$4 sm:$0xff]  }
  0x7e   :  { %1151 = vmatpush1.bf16.msra.mxu0 %v2826_v47  ;;  %v326_v42 = vunpack.c.0.s8 %v325_v40  ;;  %v2946_v40 = vld [vmem:[#allocation7 + $0x2e0] ss:$16 sps:$4 sm:$0xff]  }
  0x7f   :  { %1152 = vmatprep.subr.bf16.mxu0 %v2834_v48 }
  0x80   :  { %1237 = vmatpush1.bf16.msra.mxu1 %v2829_v55  ;;  %v3410_v45 = vsub.s32 %v326_v42, %v3404_v43  ;;  %v2954_v42 = vld [vmem:[#allocation7 + $0x304] ss:$16 sps:$4 sm:$0xff]  }
  0x81   :  { %1238 = vmatprep.subr.bf16.mxu1 %v2837_v1 }
  0x82   :  { %1153 = vmatpush1.bf16.msra.mxu0 %v2832_v51  ;;  %v3413_v47 = vrot.slane %v2455_v44, %v3410_v45  ;;  %v337_v48 = vrot.slane %v323_v46, %v3410_v45  ;;  %v2957_v44 = vld [vmem:[#allocation7 + $0x30c] ss:$16 sps:$4 sm:$0xff]   ;;  %v2952_v46 = vld [vmem:[#allocation7 + $0x300] ss:$16 sps:$4 sm:$0xff]  }
  0x83   :  { %1154 = vmatprep.subr.bf16.mxu0 %v2840_v52 }
  0x84   :  { %1239 = vmatpush1.bf16.msra.mxu1 %v2835_v60  ;;  %v341_v49 = vpack.i.b16 %v3413_v47, %v3413_v47  ;;  %v348_v52 = vpack.i.b16 %v337_v48, %v337_v48  ;;  %v339_v60 = vcombine.high %v337_v48, %v337_v48  ;;  %v2955_v48 = vld [vmem:[#allocation7 + $0x308] ss:$16 sps:$4 sm:$0xff]  }
  0x85   :  { %1240 = vmatprep.subr.bf16.mxu1 %v2843_v61 }
  0x86   :  { %1155 = vmatpush1.bf16.msra.mxu0 %v2838_v56  ;;  %v346_v54 = vrot.slane %v341_v49, %v3419_v50  ;;  %v353_v56 = vrot.slane %v348_v52, %v3419_v50  ;;  %v2960_v49 = vld [vmem:[#allocation7 + $0x324] ss:$16 sps:$4 sm:$0xff]   ;;  %v2958_v52 = vld [vmem:[#allocation7 + $0x320] ss:$16 sps:$4 sm:$0xff]  }
  0x87   :  { %1156 = vmatprep.subr.bf16.mxu0 %v2846_v57 }
  0x88   :  { %1241 = vmatpush1.bf16.msra.mxu1 %v2841_v0  ;;  %v2904_v0 = vld [vmem:[#allocation7 + $0x200] ss:$16 sps:$4 sm:$0xff]  }
  0x89   :  { %1242 = vmatprep.subr.bf16.mxu1 %v2849_v2  ;;  %v2907_v2 = vld [vmem:[#allocation7 + $0x208] ss:$16 sps:$4 sm:$0xff]  }
  0x8a   :  { %1157 = vmatpush1.bf16.msra.mxu0 %v2844_v58 }
  0x8b   :  { %1158 = vmatprep.subr.bf16.mxu0 %v2852_v59 }
  0x8c   :  { %1243 = vmatpush1.bf16.msra.mxu1 %v2847_v5  ;;  %v2915_v5 = vld [vmem:[#allocation7 + $0x22c] ss:$16 sps:$4 sm:$0xff]  }
  0x8d   :  { %1244 = vmatprep.subr.bf16.mxu1 %v2855_v6 }
  0x8e   :  { %1159 = vmatpush1.bf16.msra.mxu0 %v2850_v62  ;;  %v3298_v62 = vmov 0  }
  0x8f   :  { %1160 = vmatprep.subr.bf16.mxu0 %v2858_v63 }
  0x90   :  { %1245 = vmatpush1.bf16.msra.mxu1 %v2853_v9  ;;  %v2910_v9 = vld [vmem:[#allocation7 + $0x220] ss:$16 sps:$4 sm:$0xff]  }
  0x91   :  { %1246 = vmatprep.subr.bf16.mxu1 %v2861_v10  ;;  %v2913_v10 = vld [vmem:[#allocation7 + $0x228] ss:$16 sps:$4 sm:$0xff]  }
  0x92   :  { %1161 = vmatpush1.bf16.msra.mxu0 %v2856_v3 }
  0x93   :  { %1162 = vmatprep.subr.bf16.mxu0 %v2864_v4  ;;  %v2912_v4 = vld [vmem:[#allocation7 + $0x224] ss:$16 sps:$4 sm:$0xff]  }
  0x94   :  { %1247 = vmatpush1.bf16.msra.mxu1 %v2859_v13 }
  0x95   :  { %1248 = vmatprep.subr.bf16.mxu1 %v2867_v14 }
  0x96   :  { %1163 = vmatpush1.bf16.msra.mxu0 %v2862_v7  ;;  %v362_v7 = vpack.i.b16 %v339_v60, %v339_v60  ;;  %v2973_v60 = vld [vmem:[#allocation7 + $0x368] ss:$16 sps:$4 sm:$0xff]  }
  0x97   :  { %1164 = vmatprep.subr.bf16.mxu0 %v2870_v8 }
  0x98   :  { %1249 = vmatpush1.bf16.msra.mxu1 %v2865_v17  ;;  %v367_v14 = vrot.slane %v362_v7, %v3419_v50  ;;  %v2982_v7 = vld [vmem:[#allocation7 + $0x3a0] ss:$16 sps:$4 sm:$0xff]  }
  0x99   :  { %1250 = vmatprep.subr.bf16.mxu1 %v2873_v18  ;;  %v2916_v18 = vld [vmem:[#allocation7 + $0x240] ss:$16 sps:$4 sm:$0xff]  }
  0x9a   :  { %1165 = vmatpush1.bf16.msra.mxu0 %v2868_v11  ;;  %v2918_v11 = vld [vmem:[#allocation7 + $0x244] ss:$16 sps:$4 sm:$0xff]  }
  0x9b   :  { %1166 = vmatprep.subr.bf16.mxu0 %v2876_v12  ;;  %v2921_v12 = vld [vmem:[#allocation7 + $0x24c] ss:$16 sps:$4 sm:$0xff]  }
  0x9c   :  { %1251 = vmatpush1.bf16.msra.mxu1 %v2871_v20  ;;  %v2924_v20 = vld [vmem:[#allocation7 + $0x264] ss:$16 sps:$4 sm:$0xff]  }
  0x9d   :  { %1252 = vmatprep.subr.bf16.mxu1 %v2879_v21  ;;  %v2927_v21 = vld [vmem:[#allocation7 + $0x26c] ss:$16 sps:$4 sm:$0xff]  }
  0x9e   :  { %1167 = vmatpush1.bf16.msra.mxu0 %v2874_v15 }
  0x9f   :  { %1168 = vmatprep.subr.bf16.mxu0 %v2882_v16 }
  0xa0   :  { %1253 = vmatpush1.bf16.msra.mxu1 %v2877_v22 }
  0xa1   :  { %1254 = vmatprep.subr.bf16.mxu1 %v2885_v23 }
  0xa2   :  { %1169 = vmatpush1.bf16.msra.mxu0 %v2880_v19  ;;  %v2919_v19 = vld [vmem:[#allocation7 + $0x248] ss:$16 sps:$4 sm:$0xff]  }
  0xa3   :  { %1170 = vmatprep.subr.bf16.mxu0 %v2888_v25  ;;  %v2925_v25 = vld [vmem:[#allocation7 + $0x268] ss:$16 sps:$4 sm:$0xff]  }
  0xa4   :  { %1255 = vmatpush1.bf16.msra.mxu1 %v2883_v24  ;;  %v2922_v24 = vld [vmem:[#allocation7 + $0x260] ss:$16 sps:$4 sm:$0xff]  }
  0xa5   :  { %1256 = vmatprep.subr.bf16.mxu1 %v2891_v26  ;;  %v2930_v26 = vld [vmem:[#allocation7 + $0x284] ss:$16 sps:$4 sm:$0xff]  }
  0xa6   :  { %1171 = vmatpush1.bf16.msra.mxu0 %v2886_v27  ;;  %v2933_v27 = vld [vmem:[#allocation7 + $0x28c] ss:$16 sps:$4 sm:$0xff]  }
  0xa7   :  { %1172 = vmatprep.subr.bf16.mxu0 %v2894_v29  ;;  %v2931_v29 = vld [vmem:[#allocation7 + $0x288] ss:$16 sps:$4 sm:$0xff]  }
  0xa8   :  { %1257 = vmatpush1.bf16.msra.mxu1 %v2889_v28  ;;  %v2928_v28 = vld [vmem:[#allocation7 + $0x280] ss:$16 sps:$4 sm:$0xff]  }
  0xa9   :  { %1258 = vmatprep.subr.bf16.mxu1 %v2897_v30  ;;  %v2936_v30 = vld [vmem:[#allocation7 + $0x2a4] ss:$16 sps:$4 sm:$0xff]  }
  0xaa   :  { %1173 = vmatpush1.bf16.msra.mxu0 %v2892_v31  ;;  %v2939_v31 = vld [vmem:[#allocation7 + $0x2ac] ss:$16 sps:$4 sm:$0xff]  }
  0xab   :  { %1174 = vmatprep.subr.bf16.mxu0 %v2900_v33  ;;  %v2937_v33 = vld [vmem:[#allocation7 + $0x2a8] ss:$16 sps:$4 sm:$0xff]  }
  0xac   :  { %1259 = vmatpush1.bf16.msra.mxu1 %v2895_v32  ;;  %v2934_v32 = vld [vmem:[#allocation7 + $0x2a0] ss:$16 sps:$4 sm:$0xff]  }
  0xad   :  { %1260 = vmatprep.subr.bf16.mxu1 %v2903_v34  ;;  %v2942_v34 = vld [vmem:[#allocation7 + $0x2c4] ss:$16 sps:$4 sm:$0xff]  }
  0xae   :  { %1175 = vmatpush1.bf16.msra.mxu0 %v2898_v35  ;;  %v2945_v35 = vld [vmem:[#allocation7 + $0x2cc] ss:$16 sps:$4 sm:$0xff]  }
  0xaf   :  { %1187 = vmatprep.subr.bf16.mxu0 %v2906_v37  ;;  %v2943_v37 = vld [vmem:[#allocation7 + $0x2c8] ss:$16 sps:$4 sm:$0xff]  }
  0xb0   :  { %1261 = vmatpush1.bf16.msra.mxu1 %v2901_v36  ;;  %v2940_v36 = vld [vmem:[#allocation7 + $0x2c0] ss:$16 sps:$4 sm:$0xff]  }
  0xb1   :  { %1273 = vmatprep.subr.bf16.mxu1 %v2909_v38  ;;  %v2948_v38 = vld [vmem:[#allocation7 + $0x2e4] ss:$16 sps:$4 sm:$0xff]  }
 0x144   :  { %v222_v51 = vpop.f32.mrb[0].mxu0 }
 0x145   :  { %v224_v53 = vpop.f32.mrb[1].mxu0 }
 0x146   :  { %v3425_v6 = vpop.f32.mrb[0].mxu1 }
 0x147   :  { %v301_v8 = vpop.f32.mrb[1].mxu1 }
 0x148   :  { %v228_v55 = vpop.f32.mrb[2].mxu0 }
 0x149   :  { %v310_v57 = vpack.c.bf16 %v228_v55, %v222_v51  ;;  %v230_v1 = vpop.f32.mrb[3].mxu0  ;;  %v2963_v51 = vld [vmem:[#allocation7 + $0x32c] ss:$16 sps:$4 sm:$0xff]  }
 0x14a   :  { %v311_v58 = vpack.c.bf16 %v230_v1, %v224_v53  ;;  %v3427_v13 = vpop.f32.mrb[2].mxu1  ;;  %v2961_v53 = vld [vmem:[#allocation7 + $0x328] ss:$16 sps:$4 sm:$0xff]   ;;  %v2969_v55 = vld [vmem:[#allocation7 + $0x34c] ss:$16 sps:$4 sm:$0xff]  }
 0x14b   :  { %v368_v59 = vadd.bf16 %v346_v54, %v310_v57  ;;  %v312_v15 = vpack.c.bf16 %v3427_v13, %v3425_v6  ;;  %v307_v16 = vpop.f32.mrb[3].mxu1  ;;  %v2966_v54 = vld [vmem:[#allocation7 + $0x344] ss:$16 sps:$4 sm:$0xff]   ;;  %v2967_v57 = vld [vmem:[#allocation7 + $0x348] ss:$16 sps:$4 sm:$0xff]  }
 0x14c   :  { %v369_v61 = vadd.bf16 %v353_v56, %v311_v58  ;;  %v313_v17 = vpack.c.bf16 %v307_v16, %v301_v8  ;;  %v2964_v56 = vld [vmem:[#allocation7 + $0x340] ss:$16 sps:$4 sm:$0xff]   ;;  %v2972_v1 = vld [vmem:[#allocation7 + $0x364] ss:$16 sps:$4 sm:$0xff]   ;;  %v2975_v58 = vld [vmem:[#allocation7 + $0x36c] ss:$16 sps:$4 sm:$0xff]  }
 0x14d   :  { %v372_v3 = vmax.bf16 %v3298_v62, %v368_v59  ;;  %v2970_v59 = vld [vmem:[#allocation7 + $0x360] ss:$16 sps:$4 sm:$0xff]   ;;  %v2985_v8 = vld [vmem:[#allocation7 + $0x3a8] ss:$16 sps:$4 sm:$0xff]  }
 0x14e   :  { %v373_v63 = vmax.bf16 %v3298_v62, %v369_v61  ;;  %v371_v22 = vadd.bf16 %v367_v14, %v313_v17  ;;  %v2978_v61 = vld [vmem:[#allocation7 + $0x384] ss:$16 sps:$4 sm:$0xff]   ;;  %v2991_v14 = vld [vmem:[#allocation7 + $0x3c8] ss:$16 sps:$4 sm:$0xff]   ;;  %v2999_v17 = vld [vmem:[#allocation7 + $0x3ec] ss:$16 sps:$4 sm:$0xff]  }
 0x14f   :  { %v3006_v6 = vld [vmem:[#allocation8 + $0x20] ss:$16 sps:$4 sm:$0xff]   ;;  %v3009_v13 = vld [vmem:[#allocation8 + $0x28] ss:$16 sps:$4 sm:$0xff]  }
 0x150   :  { %1176 = vmatprep.mubr.bf16.mxu0 %v373_v63  ;;  %1262 = vmatprep.mubr.bf16.mxu1 %v373_v63  ;;  %v375_v23 = vmax.bf16 %v3298_v62, %v371_v22  ;;  %v2981_v63 = vld [vmem:[#allocation7 + $0x38c] ss:$16 sps:$4 sm:$0xff]  }
 0x151   :  { %1177 = vmatmul.mubr.bf16.vlgmr.msra.gmra.mrb[4].mxu0 %v372_v3  ;;  %1263 = vmatmul.mubr.bf16.vlgmr.msra.gmra.mrb[4].mxu1 %v372_v3  ;;  %v338_v3 = vcombine.high %v3413_v47, %v3413_v47  ;;  %v2996_v47 = vld [vmem:[#allocation7 + $0x3e4] ss:$16 sps:$4 sm:$0xff]   ;;  %v3005_v22 = vld [vmem:[#allocation8 + $0xc] ss:$16 sps:$4 sm:$0xff]  }
 0x152   :  { %1188 = vmatpush1.bf16.msra.mxu0 %v2904_v0  ;;  %1274 = vmatpush1.bf16.msra.mxu1 %v2907_v2  ;;  %v2976_v0 = vld [vmem:[#allocation7 + $0x380] ss:$16 sps:$4 sm:$0xff]   ;;  %v2979_v2 = vld [vmem:[#allocation7 + $0x388] ss:$16 sps:$4 sm:$0xff]  }
 0x153   :  { %1189 = vmatprep.subr.bf16.mxu0 %v2912_v4  ;;  %1275 = vmatprep.subr.bf16.mxu1 %v2915_v5  ;;  %v2984_v4 = vld [vmem:[#allocation7 + $0x3a4] ss:$16 sps:$4 sm:$0xff]   ;;  %v2987_v5 = vld [vmem:[#allocation7 + $0x3ac] ss:$16 sps:$4 sm:$0xff]  }
 0x154   :  { %1219 = vmatprep.mubr.bf16.mxu0 %v375_v23  ;;  %1305 = vmatprep.mubr.bf16.mxu1 %v375_v23  ;;  %v3000_v23 = vld [vmem:[#allocation8] ss:$16 sps:$4 sm:$0xff]  }
 0x156   :  { %1190 = vmatpush1.bf16.msra.mxu0 %v2910_v9  ;;  %1276 = vmatpush1.bf16.msra.mxu1 %v2913_v10  ;;  %v355_v9 = vpack.i.b16 %v338_v3, %v338_v3  ;;  %v2990_v10 = vld [vmem:[#allocation7 + $0x3c4] ss:$16 sps:$4 sm:$0xff]   ;;  %v3063_v3 = vld [vmem:[#allocation8 + $0x148] ss:$16 sps:$4 sm:$0xff]  }
 0x157   :  { %1191 = vmatprep.subr.bf16.mxu0 %v2918_v11  ;;  %1277 = vmatprep.subr.bf16.mxu1 %v2921_v12  ;;  %v2993_v11 = vld [vmem:[#allocation7 + $0x3cc] ss:$16 sps:$4 sm:$0xff]   ;;  %v2988_v12 = vld [vmem:[#allocation7 + $0x3c0] ss:$16 sps:$4 sm:$0xff]  }
 0x158   :  { %v360_v16 = vrot.slane %v355_v9, %v3419_v50  ;;  %v3074_v9 = vld [vmem:[#allocation8 + $0x184] ss:$16 sps:$4 sm:$0xff]  }
 0x15a   :  { %1192 = vmatpush1.bf16.msra.mxu0 %v2916_v18  ;;  %1278 = vmatpush1.bf16.msra.mxu1 %v2919_v19  ;;  %v2994_v18 = vld [vmem:[#allocation7 + $0x3e0] ss:$16 sps:$4 sm:$0xff]   ;;  %v2997_v19 = vld [vmem:[#allocation7 + $0x3e8] ss:$16 sps:$4 sm:$0xff]  }
 0x15b   :  { %1193 = vmatprep.subr.bf16.mxu0 %v2924_v20  ;;  %1279 = vmatprep.subr.bf16.mxu1 %v2927_v21  ;;  %v370_v20 = vadd.bf16 %v360_v16, %v312_v15  ;;  %v3002_v21 = vld [vmem:[#allocation8 + $0x4] ss:$16 sps:$4 sm:$0xff]   ;;  %v3083_v16 = vld [vmem:[#allocation8 + $0x1ac] ss:$16 sps:$4 sm:$0xff]  }
 0x15c   :  { %v3014_v15 = vld [vmem:[#allocation8 + $0x44] ss:$16 sps:$4 sm:$0xff]  }
 0x15e   :  { %1194 = vmatpush1.bf16.msra.mxu0 %v2922_v24  ;;  %1280 = vmatpush1.bf16.msra.mxu1 %v2925_v25  ;;  %v3003_v24 = vld [vmem:[#allocation8 + $0x8] ss:$16 sps:$4 sm:$0xff]   ;;  %v374_v25 = vmax.bf16 %v3298_v62, %v370_v20  ;;  %v3084_v20 = vld [vmem:[#allocation8 + $0x1c0] ss:$16 sps:$4 sm:$0xff]  }
 0x15f   :  { %1195 = vmatprep.subr.bf16.mxu0 %v2930_v26  ;;  %1281 = vmatprep.subr.bf16.mxu1 %v2933_v27  ;;  %v3008_v26 = vld [vmem:[#allocation8 + $0x24] ss:$16 sps:$4 sm:$0xff]   ;;  %v3011_v27 = vld [vmem:[#allocation8 + $0x2c] ss:$16 sps:$4 sm:$0xff]  }
 0x162   :  { %1196 = vmatpush1.bf16.msra.mxu0 %v2928_v28  ;;  %1282 = vmatpush1.bf16.msra.mxu1 %v2931_v29  ;;  %v3017_v28 = vld [vmem:[#allocation8 + $0x4c] ss:$16 sps:$4 sm:$0xff]   ;;  %v3012_v29 = vld [vmem:[#allocation8 + $0x40] ss:$16 sps:$4 sm:$0xff]  }
 0x163   :  { %1197 = vmatprep.subr.bf16.mxu0 %v2936_v30  ;;  %1283 = vmatprep.subr.bf16.mxu1 %v2939_v31  ;;  %v3015_v30 = vld [vmem:[#allocation8 + $0x48] ss:$16 sps:$4 sm:$0xff]   ;;  %v3020_v31 = vld [vmem:[#allocation8 + $0x64] ss:$16 sps:$4 sm:$0xff]  }
 0x166   :  { %1198 = vmatpush1.bf16.msra.mxu0 %v2934_v32  ;;  %1284 = vmatpush1.bf16.msra.mxu1 %v2937_v33  ;;  %v3023_v32 = vld [vmem:[#allocation8 + $0x6c] ss:$16 sps:$4 sm:$0xff]   ;;  %v3018_v33 = vld [vmem:[#allocation8 + $0x60] ss:$16 sps:$4 sm:$0xff]  }
 0x167   :  { %1199 = vmatprep.subr.bf16.mxu0 %v2942_v34  ;;  %1285 = vmatprep.subr.bf16.mxu1 %v2945_v35  ;;  %v3021_v34 = vld [vmem:[#allocation8 + $0x68] ss:$16 sps:$4 sm:$0xff]   ;;  %v3026_v35 = vld [vmem:[#allocation8 + $0x84] ss:$16 sps:$4 sm:$0xff]  }
 0x16a   :  { %1200 = vmatpush1.bf16.msra.mxu0 %v2940_v36  ;;  %1286 = vmatpush1.bf16.msra.mxu1 %v2943_v37  ;;  %v3029_v36 = vld [vmem:[#allocation8 + $0x8c] ss:$16 sps:$4 sm:$0xff]   ;;  %v3024_v37 = vld [vmem:[#allocation8 + $0x80] ss:$16 sps:$4 sm:$0xff]  }
 0x16b   :  { %1201 = vmatprep.subr.bf16.mxu0 %v2948_v38  ;;  %1287 = vmatprep.subr.bf16.mxu1 %v2951_v39  ;;  %v3027_v38 = vld [vmem:[#allocation8 + $0x88] ss:$16 sps:$4 sm:$0xff]   ;;  %v3032_v39 = vld [vmem:[#allocation8 + $0xa4] ss:$16 sps:$4 sm:$0xff]  }
 0x16e   :  { %1202 = vmatpush1.bf16.msra.mxu0 %v2946_v40  ;;  %1288 = vmatpush1.bf16.msra.mxu1 %v2949_v41  ;;  %v3035_v40 = vld [vmem:[#allocation8 + $0xac] ss:$16 sps:$4 sm:$0xff]   ;;  %v3030_v41 = vld [vmem:[#allocation8 + $0xa0] ss:$16 sps:$4 sm:$0xff]  }
 0x16f   :  { %1203 = vmatprep.subr.bf16.mxu0 %v2954_v42  ;;  %1289 = vmatprep.subr.bf16.mxu1 %v2957_v44  ;;  %v3033_v42 = vld [vmem:[#allocation8 + $0xa8] ss:$16 sps:$4 sm:$0xff]   ;;  %v3038_v44 = vld [vmem:[#allocation8 + $0xc4] ss:$16 sps:$4 sm:$0xff]  }
 0x172   :  { %1204 = vmatpush1.bf16.msra.mxu0 %v2952_v46  ;;  %1290 = vmatpush1.bf16.msra.mxu1 %v2955_v48  ;;  %v3041_v46 = vld [vmem:[#allocation8 + $0xcc] ss:$16 sps:$4 sm:$0xff]   ;;  %v3036_v48 = vld [vmem:[#allocation8 + $0xc0] ss:$16 sps:$4 sm:$0xff]  }
 0x173   :  { %1205 = vmatprep.subr.bf16.mxu0 %v2960_v49  ;;  %1291 = vmatprep.subr.bf16.mxu1 %v2963_v51  ;;  %v3039_v49 = vld [vmem:[#allocation8 + $0xc8] ss:$16 sps:$4 sm:$0xff]   ;;  %v3044_v51 = vld [vmem:[#allocation8 + $0xe4] ss:$16 sps:$4 sm:$0xff]  }
 0x176   :  { %1206 = vmatpush1.bf16.msra.mxu0 %v2958_v52  ;;  %1292 = vmatpush1.bf16.msra.mxu1 %v2961_v53  ;;  %v3047_v52 = vld [vmem:[#allocation8 + $0xec] ss:$16 sps:$4 sm:$0xff]   ;;  %v3042_v53 = vld [vmem:[#allocation8 + $0xe0] ss:$16 sps:$4 sm:$0xff]  }
 0x177   :  { %1207 = vmatprep.subr.bf16.mxu0 %v2966_v54  ;;  %1293 = vmatprep.subr.bf16.mxu1 %v2969_v55  ;;  %v3045_v54 = vld [vmem:[#allocation8 + $0xe8] ss:$16 sps:$4 sm:$0xff]   ;;  %v3050_v55 = vld [vmem:[#allocation8 + $0x104] ss:$16 sps:$4 sm:$0xff]  }
 0x17a   :  { %1208 = vmatpush1.bf16.msra.mxu0 %v2964_v56  ;;  %1294 = vmatpush1.bf16.msra.mxu1 %v2967_v57  ;;  %v3053_v56 = vld [vmem:[#allocation8 + $0x10c] ss:$16 sps:$4 sm:$0xff]   ;;  %v3048_v57 = vld [vmem:[#allocation8 + $0x100] ss:$16 sps:$4 sm:$0xff]  }
 0x17b   :  { %1209 = vmatprep.subr.bf16.mxu0 %v2972_v1  ;;  %1295 = vmatprep.subr.bf16.mxu1 %v2975_v58  ;;  %v3051_v1 = vld [vmem:[#allocation8 + $0x108] ss:$16 sps:$4 sm:$0xff]   ;;  %v3056_v58 = vld [vmem:[#allocation8 + $0x124] ss:$16 sps:$4 sm:$0xff]  }
 0x17e   :  { %1210 = vmatpush1.bf16.msra.mxu0 %v2970_v59  ;;  %1296 = vmatpush1.bf16.msra.mxu1 %v2973_v60  ;;  %v3059_v59 = vld [vmem:[#allocation8 + $0x12c] ss:$16 sps:$4 sm:$0xff]   ;;  %v3054_v60 = vld [vmem:[#allocation8 + $0x120] ss:$16 sps:$4 sm:$0xff]  }
 0x17f   :  { %1211 = vmatprep.subr.bf16.mxu0 %v2978_v61  ;;  %1297 = vmatprep.subr.bf16.mxu1 %v2981_v63  ;;  %v3057_v61 = vld [vmem:[#allocation8 + $0x128] ss:$16 sps:$4 sm:$0xff]   ;;  %v3062_v63 = vld [vmem:[#allocation8 + $0x144] ss:$16 sps:$4 sm:$0xff]  }
 0x182   :  { %1212 = vmatpush1.bf16.msra.mxu0 %v2976_v0  ;;  %1298 = vmatpush1.bf16.msra.mxu1 %v2979_v2  ;;  %v3065_v0 = vld [vmem:[#allocation8 + $0x14c] ss:$16 sps:$4 sm:$0xff]   ;;  %v3060_v2 = vld [vmem:[#allocation8 + $0x140] ss:$16 sps:$4 sm:$0xff]  }
 0x183   :  { %1213 = vmatprep.subr.bf16.mxu0 %v2984_v4  ;;  %1299 = vmatprep.subr.bf16.mxu1 %v2987_v5  ;;  %v3068_v4 = vld [vmem:[#allocation8 + $0x164] ss:$16 sps:$4 sm:$0xff]   ;;  %v3071_v5 = vld [vmem:[#allocation8 + $0x16c] ss:$16 sps:$4 sm:$0xff]  }
 0x186   :  { %1214 = vmatpush1.bf16.msra.mxu0 %v2982_v7  ;;  %1300 = vmatpush1.bf16.msra.mxu1 %v2985_v8  ;;  %v3066_v7 = vld [vmem:[#allocation8 + $0x160] ss:$16 sps:$4 sm:$0xff]   ;;  %v3069_v8 = vld [vmem:[#allocation8 + $0x168] ss:$16 sps:$4 sm:$0xff]  }
 0x187   :  { %1215 = vmatprep.subr.bf16.mxu0 %v2990_v10  ;;  %1301 = vmatprep.subr.bf16.mxu1 %v2993_v11  ;;  %v3077_v10 = vld [vmem:[#allocation8 + $0x18c] ss:$16 sps:$4 sm:$0xff]   ;;  %v3072_v11 = vld [vmem:[#allocation8 + $0x180] ss:$16 sps:$4 sm:$0xff]  }
 0x18a   :  { %1216 = vmatpush1.bf16.msra.mxu0 %v2988_v12  ;;  %1302 = vmatpush1.bf16.msra.mxu1 %v2991_v14  ;;  %v3075_v12 = vld [vmem:[#allocation8 + $0x188] ss:$16 sps:$4 sm:$0xff]   ;;  %v3080_v14 = vld [vmem:[#allocation8 + $0x1a4] ss:$16 sps:$4 sm:$0xff]  }
 0x18b   :  { %1217 = vmatprep.subr.bf16.mxu0 %v2996_v47  ;;  %1303 = vmatprep.subr.bf16.mxu1 %v2999_v17  ;;  %v3078_v47 = vld [vmem:[#allocation8 + $0x1a0] ss:$16 sps:$4 sm:$0xff]   ;;  %v3081_v17 = vld [vmem:[#allocation8 + $0x1a8] ss:$16 sps:$4 sm:$0xff]  }
 0x18e   :  { %1218 = vmatpush1.bf16.msra.mxu0 %v2994_v18  ;;  %1304 = vmatpush1.bf16.msra.mxu1 %v2997_v19  ;;  %v3086_v18 = vld [vmem:[#allocation8 + $0x1c4] ss:$16 sps:$4 sm:$0xff]   ;;  %v3089_v19 = vld [vmem:[#allocation8 + $0x1cc] ss:$16 sps:$4 sm:$0xff]  }
 0x18f   :  { %2150 = vmatprep.subr.bf16.mxu0 %v3002_v21  ;;  %2236 = vmatprep.subr.bf16.mxu1 %v3005_v22  ;;  %v3087_v21 = vld [vmem:[#allocation8 + $0x1c8] ss:$16 sps:$4 sm:$0xff]   ;;  %v3092_v22 = vld [vmem:[#allocation8 + $0x1e4] ss:$16 sps:$4 sm:$0xff]  }
 0x191   :  { %1220 = vmatmul.mubr.bf16.vlgmr.msra.gmra.mrb[4].mxu0 %v374_v25  ;;  %1306 = vmatmul.mubr.bf16.vlgmr.msra.gmra.mrb[4].mxu1 %v374_v25  ;;  %v3093_v25 = vld [vmem:[#allocation8 + $0x1e8] ss:$16 sps:$4 sm:$0xff]  }
 0x192   :  { %2151 = vmatpush1.bf16.msra.mxu0 %v3000_v23  ;;  %2237 = vmatpush1.bf16.msra.mxu1 %v3003_v24  ;;  %v3095_v23 = vld [vmem:[#allocation8 + $0x1ec] ss:$16 sps:$4 sm:$0xff]   ;;  %v3090_v24 = vld [vmem:[#allocation8 + $0x1e0] ss:$16 sps:$4 sm:$0xff]  }
 0x193   :  { %2152 = vmatprep.subr.bf16.mxu0 %v3008_v26  ;;  %2238 = vmatprep.subr.bf16.mxu1 %v3011_v27  ;;  %v3098_v26 = vld [vmem:[#allocation8 + $0x204] ss:$16 sps:$4 sm:$0xff]   ;;  %v3101_v27 = vld [vmem:[#allocation8 + $0x20c] ss:$16 sps:$4 sm:$0xff]  }
 0x196   :  { %2153 = vmatpush1.bf16.msra.mxu0 %v3006_v6  ;;  %2239 = vmatpush1.bf16.msra.mxu1 %v3009_v13  ;;  %v2584_v6 = vld.sshfl [vmem:[%s3498_s4] sm:$0x33 pattern:$0x75316420] }
 0x197   :  { %2154 = vmatprep.subr.bf16.mxu0 %v3014_v15  ;;  %2240 = vmatprep.subr.bf16.mxu1 %v3017_v28  ;;  %v1329_v13 = vcombine.high %v2584_v6, %v2584_v6  ;;  %v3445_v28 = vrot.slane %v2584_v6, %v3410_v45  ;;  %v3149_v6 = vld [vmem:[#allocation8 + $0x30c] ss:$16 sps:$4 sm:$0xff]  }
 0x199   :  { %v1343_v15 = vrot.slane %v1329_v13, %v3410_v45  ;;  %v3144_v13 = vld [vmem:[#allocation8 + $0x300] ss:$16 sps:$4 sm:$0xff]  }
 0x19a   :  { %2155 = vmatpush1.bf16.msra.mxu0 %v3012_v29  ;;  %2241 = vmatpush1.bf16.msra.mxu1 %v3015_v30  ;;  %v1347_v30 = vpack.i.b16 %v3445_v28, %v3445_v28 }
 0x19b   :  { %2156 = vmatprep.subr.bf16.mxu0 %v3020_v31  ;;  %2242 = vmatprep.subr.bf16.mxu1 %v3023_v32  ;;  %v1345_v29 = vcombine.high %v1343_v15, %v1343_v15  ;;  %v1354_v31 = vpack.i.b16 %v1343_v15, %v1343_v15  ;;  %v3147_v15 = vld [vmem:[#allocation8 + $0x308] ss:$16 sps:$4 sm:$0xff]  }
 0x19d   :  { %v1368_v32 = vpack.i.b16 %v1345_v29, %v1345_v29  ;;  %v3152_v29 = vld [vmem:[#allocation8 + $0x324] ss:$16 sps:$4 sm:$0xff]  }
 0x19e   :  { %2157 = vmatpush1.bf16.msra.mxu0 %v3018_v33  ;;  %2243 = vmatpush1.bf16.msra.mxu1 %v3021_v34 }
 0x19f   :  { %2158 = vmatprep.subr.bf16.mxu0 %v3026_v35  ;;  %2244 = vmatprep.subr.bf16.mxu1 %v3029_v36 }
 0x1a2   :  { %2159 = vmatpush1.bf16.msra.mxu0 %v3024_v37  ;;  %2245 = vmatpush1.bf16.msra.mxu1 %v3027_v38  ;;  %v1352_v37 = vrot.slane %v1347_v30, %v3419_v50  ;;  %v3155_v30 = vld [vmem:[#allocation8 + $0x32c] ss:$16 sps:$4 sm:$0xff]  }
 0x1a3   :  { %2160 = vmatprep.subr.bf16.mxu0 %v3032_v39  ;;  %2246 = vmatprep.subr.bf16.mxu1 %v3035_v40  ;;  %v1359_v40 = vrot.slane %v1354_v31, %v3419_v50  ;;  %v3150_v31 = vld [vmem:[#allocation8 + $0x320] ss:$16 sps:$4 sm:$0xff]  }
 0x1a6   :  { %2161 = vmatpush1.bf16.msra.mxu0 %v3030_v41  ;;  %2247 = vmatpush1.bf16.msra.mxu1 %v3033_v42 }
 0x1a7   :  { %2162 = vmatprep.subr.bf16.mxu0 %v3038_v44  ;;  %2248 = vmatprep.subr.bf16.mxu1 %v3041_v46 }
 0x1aa   :  { %2163 = vmatpush1.bf16.msra.mxu0 %v3036_v48  ;;  %2249 = vmatpush1.bf16.msra.mxu1 %v3039_v49  ;;  %v1373_v48 = vrot.slane %v1368_v32, %v3419_v50  ;;  %v3153_v32 = vld [vmem:[#allocation8 + $0x328] ss:$16 sps:$4 sm:$0xff]  }
 0x1ab   :  { %2164 = vmatprep.subr.bf16.mxu0 %v3044_v51  ;;  %2250 = vmatprep.subr.bf16.mxu1 %v3047_v52 }
 0x1ae   :  { %2165 = vmatpush1.bf16.msra.mxu0 %v3042_v53  ;;  %2251 = vmatpush1.bf16.msra.mxu1 %v3045_v54 }
 0x1af   :  { %2166 = vmatprep.subr.bf16.mxu0 %v3050_v55  ;;  %2252 = vmatprep.subr.bf16.mxu1 %v3053_v56  ;;  %v3096_v56 = vld [vmem:[#allocation8 + $0x200] ss:$16 sps:$4 sm:$0xff]  }
 0x1b2   :  { %2167 = vmatpush1.bf16.msra.mxu0 %v3048_v57  ;;  %2253 = vmatpush1.bf16.msra.mxu1 %v3051_v1  ;;  %v3099_v57 = vld [vmem:[#allocation8 + $0x208] ss:$16 sps:$4 sm:$0xff]  }
 0x1b3   :  { %2168 = vmatprep.subr.bf16.mxu0 %v3056_v58  ;;  %2254 = vmatprep.subr.bf16.mxu1 %v3059_v59  ;;  %v3104_v58 = vld [vmem:[#allocation8 + $0x224] ss:$16 sps:$4 sm:$0xff]   ;;  %v3107_v59 = vld [vmem:[#allocation8 + $0x22c] ss:$16 sps:$4 sm:$0xff]  }
 0x1b6   :  { %2169 = vmatpush1.bf16.msra.mxu0 %v3054_v60  ;;  %2255 = vmatpush1.bf16.msra.mxu1 %v3057_v61  ;;  %v3102_v61 = vld [vmem:[#allocation8 + $0x220] ss:$16 sps:$4 sm:$0xff]  }
 0x1b7   :  { %2170 = vmatprep.subr.bf16.mxu0 %v3062_v63  ;;  %2256 = vmatprep.subr.bf16.mxu1 %v3065_v0  ;;  %v3105_v63 = vld [vmem:[#allocation8 + $0x228] ss:$16 sps:$4 sm:$0xff]   ;;  %v3110_v0 = vld [vmem:[#allocation8 + $0x244] ss:$16 sps:$4 sm:$0xff]  }
 0x1ba   :  { %2171 = vmatpush1.bf16.msra.mxu0 %v3060_v2  ;;  %2257 = vmatpush1.bf16.msra.mxu1 %v3063_v3  ;;  %v3113_v2 = vld [vmem:[#allocation8 + $0x24c] ss:$16 sps:$4 sm:$0xff]   ;;  %v3108_v3 = vld [vmem:[#allocation8 + $0x240] ss:$16 sps:$4 sm:$0xff]  }
 0x1bb   :  { %2172 = vmatprep.subr.bf16.mxu0 %v3068_v4  ;;  %2258 = vmatprep.subr.bf16.mxu1 %v3071_v5  ;;  %v3111_v4 = vld [vmem:[#allocation8 + $0x248] ss:$16 sps:$4 sm:$0xff]   ;;  %v3116_v5 = vld [vmem:[#allocation8 + $0x264] ss:$16 sps:$4 sm:$0xff]  }
 0x1be   :  { %2173 = vmatpush1.bf16.msra.mxu0 %v3066_v7  ;;  %2259 = vmatpush1.bf16.msra.mxu1 %v3069_v8  ;;  %v3119_v7 = vld [vmem:[#allocation8 + $0x26c] ss:$16 sps:$4 sm:$0xff]   ;;  %v3114_v8 = vld [vmem:[#allocation8 + $0x260] ss:$16 sps:$4 sm:$0xff]  }
 0x1bf   :  { %2174 = vmatprep.subr.bf16.mxu0 %v3074_v9  ;;  %2260 = vmatprep.subr.bf16.mxu1 %v3077_v10  ;;  %v3117_v9 = vld [vmem:[#allocation8 + $0x268] ss:$16 sps:$4 sm:$0xff]   ;;  %v3122_v10 = vld [vmem:[#allocation8 + $0x284] ss:$16 sps:$4 sm:$0xff]  }
 0x1c2   :  { %2175 = vmatpush1.bf16.msra.mxu0 %v3072_v11  ;;  %2261 = vmatpush1.bf16.msra.mxu1 %v3075_v12  ;;  %v3125_v11 = vld [vmem:[#allocation8 + $0x28c] ss:$16 sps:$4 sm:$0xff]   ;;  %v3120_v12 = vld [vmem:[#allocation8 + $0x280] ss:$16 sps:$4 sm:$0xff]  }
 0x1c3   :  { %2176 = vmatprep.subr.bf16.mxu0 %v3080_v14  ;;  %2262 = vmatprep.subr.bf16.mxu1 %v3083_v16  ;;  %v3123_v14 = vld [vmem:[#allocation8 + $0x288] ss:$16 sps:$4 sm:$0xff]   ;;  %v3128_v16 = vld [vmem:[#allocation8 + $0x2a4] ss:$16 sps:$4 sm:$0xff]  }
 0x1c6   :  { %2177 = vmatpush1.bf16.msra.mxu0 %v3078_v47  ;;  %2263 = vmatpush1.bf16.msra.mxu1 %v3081_v17  ;;  %v3131_v47 = vld [vmem:[#allocation8 + $0x2ac] ss:$16 sps:$4 sm:$0xff]   ;;  %v3126_v17 = vld [vmem:[#allocation8 + $0x2a0] ss:$16 sps:$4 sm:$0xff]  }
 0x1c7   :  { %2178 = vmatprep.subr.bf16.mxu0 %v3086_v18  ;;  %2264 = vmatprep.subr.bf16.mxu1 %v3089_v19  ;;  %v3129_v18 = vld [vmem:[#allocation8 + $0x2a8] ss:$16 sps:$4 sm:$0xff]   ;;  %v3134_v19 = vld [vmem:[#allocation8 + $0x2c4] ss:$16 sps:$4 sm:$0xff]  }
 0x1ca   :  { %2179 = vmatpush1.bf16.msra.mxu0 %v3084_v20  ;;  %2265 = vmatpush1.bf16.msra.mxu1 %v3087_v21  ;;  %v3137_v20 = vld [vmem:[#allocation8 + $0x2cc] ss:$16 sps:$4 sm:$0xff]   ;;  %v3132_v21 = vld [vmem:[#allocation8 + $0x2c0] ss:$16 sps:$4 sm:$0xff]  }
 0x1cb   :  { %2180 = vmatprep.subr.bf16.mxu0 %v3092_v22  ;;  %2266 = vmatprep.subr.bf16.mxu1 %v3095_v23  ;;  %v3135_v22 = vld [vmem:[#allocation8 + $0x2c8] ss:$16 sps:$4 sm:$0xff]   ;;  %v3140_v23 = vld [vmem:[#allocation8 + $0x2e4] ss:$16 sps:$4 sm:$0xff]  }
 0x1ce   :  { %2181 = vmatpush1.bf16.msra.mxu0 %v3090_v24  ;;  %2267 = vmatpush1.bf16.msra.mxu1 %v3093_v25  ;;  %v3143_v24 = vld [vmem:[#allocation8 + $0x2ec] ss:$16 sps:$4 sm:$0xff]   ;;  %v3138_v25 = vld [vmem:[#allocation8 + $0x2e0] ss:$16 sps:$4 sm:$0xff]  }
 0x1cf   :  { %2193 = vmatprep.subr.bf16.mxu0 %v3098_v26  ;;  %2279 = vmatprep.subr.bf16.mxu1 %v3101_v27  ;;  %v3141_v26 = vld [vmem:[#allocation8 + $0x2e8] ss:$16 sps:$4 sm:$0xff]   ;;  %v3146_v27 = vld [vmem:[#allocation8 + $0x304] ss:$16 sps:$4 sm:$0xff]  }
 0x264   :  { %v1221_v33 = vpop.f32.mrb[4].mxu0  ;;  %v3449_v34 = vpop.f32.mrb[4].mxu1 }
 0x265   :  { %v1223_v35 = vpop.f32.mrb[5].mxu0  ;;  %v1309_v36 = vpop.f32.mrb[5].mxu1 }
 0x266   :  { %v1225_v38 = vpop.f32.mrb[6].mxu0  ;;  %v3452_v39 = vpop.f32.mrb[6].mxu1 }
 0x267   :  { %v1316_v41 = vpack.c.bf16 %v1225_v38, %v1221_v33  ;;  %v1318_v42 = vpack.c.bf16 %v3452_v39, %v3449_v34  ;;  %v1227_v44 = vpop.f32.mrb[7].mxu0  ;;  %v1313_v46 = vpop.f32.mrb[7].mxu1  ;;  %v3158_v33 = vld [vmem:[#allocation8 + $0x344] ss:$16 sps:$4 sm:$0xff]  }
 0x268   :  { %v1317_v49 = vpack.c.bf16 %v1227_v44, %v1223_v35  ;;  %v1319_v51 = vpack.c.bf16 %v1313_v46, %v1309_v36  ;;  %v3161_v35 = vld [vmem:[#allocation8 + $0x34c] ss:$16 sps:$4 sm:$0xff]   ;;  %v3156_v36 = vld [vmem:[#allocation8 + $0x340] ss:$16 sps:$4 sm:$0xff]   ;;  %v3164_v38 = vld [vmem:[#allocation8 + $0x364] ss:$16 sps:$4 sm:$0xff]  }
 0x269   :  { %v1374_v52 = vadd.bf16 %v1352_v37, %v1316_v41  ;;  %v3159_v37 = vld [vmem:[#allocation8 + $0x348] ss:$16 sps:$4 sm:$0xff]   ;;  %v3162_v41 = vld [vmem:[#allocation8 + $0x360] ss:$16 sps:$4 sm:$0xff]   ;;  %v3170_v46 = vld [vmem:[#allocation8 + $0x384] ss:$16 sps:$4 sm:$0xff]  }
 0x26a   :  { %v1375_v53 = vadd.bf16 %v1359_v40, %v1317_v49  ;;  %v1377_v54 = vadd.bf16 %v1373_v48, %v1319_v51  ;;  %v3167_v40 = vld [vmem:[#allocation8 + $0x36c] ss:$16 sps:$4 sm:$0xff]   ;;  %v3165_v44 = vld [vmem:[#allocation8 + $0x368] ss:$16 sps:$4 sm:$0xff]   ;;  %v3168_v49 = vld [vmem:[#allocation8 + $0x380] ss:$16 sps:$4 sm:$0xff]  }
 0x26b   :  { %v1378_v1 = vmax.bf16 %v3298_v62, %v1374_v52  ;;  %v3173_v48 = vld [vmem:[#allocation8 + $0x38c] ss:$16 sps:$4 sm:$0xff]   ;;  %v3171_v51 = vld [vmem:[#allocation8 + $0x388] ss:$16 sps:$4 sm:$0xff]   ;;  %v1344_v52 = vcombine.high %v3445_v28, %v3445_v28  ;;  %v3188_v28 = vld [vmem:[#allocation8 + $0x3e4] ss:$16 sps:$4 sm:$0xff]  }
 0x26c   :  { %v1379_v55 = vmax.bf16 %v3298_v62, %v1375_v53  ;;  %v1381_v60 = vmax.bf16 %v3298_v62, %v1377_v54  ;;  %v3176_v53 = vld [vmem:[#allocation8 + $0x3a4] ss:$16 sps:$4 sm:$0xff]   ;;  %v3179_v54 = vld [vmem:[#allocation8 + $0x3ac] ss:$16 sps:$4 sm:$0xff]  }
 0x26e   :  { %2182 = vmatprep.mubr.bf16.mxu0 %v1379_v55  ;;  %2268 = vmatprep.mubr.bf16.mxu1 %v1379_v55  ;;  %v3174_v55 = vld [vmem:[#allocation8 + $0x3a0] ss:$16 sps:$4 sm:$0xff]  }
 0x26f   :  { %2183 = vmatmul.mubr.bf16.vlgmr.msra.gmra.mrb[8].mxu0 %v1378_v1  ;;  %2269 = vmatmul.mubr.bf16.vlgmr.msra.gmra.mrb[8].mxu1 %v1378_v1  ;;  %v3182_v1 = vld [vmem:[#allocation8 + $0x3c4] ss:$16 sps:$4 sm:$0xff]  }
 0x270   :  { %2194 = vmatpush1.bf16.msra.mxu0 %v3096_v56  ;;  %2280 = vmatpush1.bf16.msra.mxu1 %v3099_v57  ;;  %v3177_v56 = vld [vmem:[#allocation8 + $0x3a8] ss:$16 sps:$4 sm:$0xff]   ;;  %v1361_v57 = vpack.i.b16 %v1344_v52, %v1344_v52 }
 0x271   :  { %2225 = vmatprep.mubr.bf16.mxu0 %v1381_v60  ;;  %2311 = vmatprep.mubr.bf16.mxu1 %v1381_v60  ;;  %v3183_v60 = vld [vmem:[#allocation8 + $0x3c8] ss:$16 sps:$4 sm:$0xff]  }
 0x272   :  { %2195 = vmatprep.subr.bf16.mxu0 %v3104_v58  ;;  %2281 = vmatprep.subr.bf16.mxu1 %v3107_v59  ;;  %v3185_v58 = vld [vmem:[#allocation8 + $0x3cc] ss:$16 sps:$4 sm:$0xff]   ;;  %v3180_v59 = vld [vmem:[#allocation8 + $0x3c0] ss:$16 sps:$4 sm:$0xff]  }
 0x274   :  { %2196 = vmatpush1.bf16.msra.mxu0 %v3102_v61  ;;  %2282 = vmatpush1.bf16.msra.mxu1 %v3105_v63  ;;  %v1366_v61 = vrot.slane %v1361_v57, %v3419_v50  ;;  %v3191_v63 = vld [vmem:[#allocation8 + $0x3ec] ss:$16 sps:$4 sm:$0xff]  }
 0x275   :  { %2197 = vmatprep.subr.bf16.mxu0 %v3110_v0  ;;  %2283 = vmatprep.subr.bf16.mxu1 %v3113_v2  ;;  %v3186_v0 = vld [vmem:[#allocation8 + $0x3e0] ss:$16 sps:$4 sm:$0xff]   ;;  %v3189_v2 = vld [vmem:[#allocation8 + $0x3e8] ss:$16 sps:$4 sm:$0xff]  }
 0x278   :  { %2198 = vmatpush1.bf16.msra.mxu0 %v3108_v3  ;;  %2284 = vmatpush1.bf16.msra.mxu1 %v3111_v4  ;;  %v1376_v3 = vadd.bf16 %v1366_v61, %v1318_v42 }
 0x279   :  { %2199 = vmatprep.subr.bf16.mxu0 %v3116_v5  ;;  %2285 = vmatprep.subr.bf16.mxu1 %v3119_v7  ;;  %v2713_v5 = vld.sshfl [vmem:[%s3500_s6] sm:$0x33 pattern:$0x75316420] }
 0x27a   :  { %v1380_v4 = vmax.bf16 %v3298_v62, %v1376_v3  ;;  %v2335_v7 = vcombine.high %v2713_v5, %v2713_v5 }
 0x27c   :  { %2200 = vmatpush1.bf16.msra.mxu0 %v3114_v8  ;;  %2286 = vmatpush1.bf16.msra.mxu1 %v3117_v9  ;;  %v2342_v8 = vrot.slane %v2713_v5, %v3410_v45  ;;  %v2349_v9 = vrot.slane %v2335_v7, %v3410_v45  ;;  %v2714_v5 = vld [vmem:[#allocation2] ss:$0 sm:$0xff] }
 0x27d   :  { %2201 = vmatprep.subr.bf16.mxu0 %v3122_v10  ;;  %2287 = vmatprep.subr.bf16.mxu1 %v3125_v11 }
 0x27e   :  { %v2350_v10 = vcombine.high %v2342_v8, %v2342_v8  ;;  %v2351_v34 = vcombine.high %v2349_v9, %v2349_v9  ;;  %v2353_v39 = vpack.i.b16 %v2342_v8, %v2342_v8  ;;  %v2360_v11 = vpack.i.b16 %v2349_v9, %v2349_v9 }
 0x280   :  { %2202 = vmatpush1.bf16.msra.mxu0 %v3120_v12  ;;  %2288 = vmatpush1.bf16.msra.mxu1 %v3123_v14  ;;  %v2367_v42 = vpack.i.b16 %v2350_v10, %v2350_v10  ;;  %v2374_v12 = vpack.i.b16 %v2351_v34, %v2351_v34 }
 0x281   :  { %2203 = vmatprep.subr.bf16.mxu0 %v3128_v16  ;;  %2289 = vmatprep.subr.bf16.mxu1 %v3131_v47 }
 0x282   :  { %v2379_v45 = vrot.slane %v2374_v12, %v3419_v50 }
 0x284   :  { %2204 = vmatpush1.bf16.msra.mxu0 %v3126_v17  ;;  %2290 = vmatpush1.bf16.msra.mxu1 %v3129_v18  ;;  %v2358_v18 = vrot.slane %v2353_v39, %v3419_v50 }
 0x285   :  { %2205 = vmatprep.subr.bf16.mxu0 %v3134_v19  ;;  %2291 = vmatprep.subr.bf16.mxu1 %v3137_v20  ;;  %v2372_v19 = vrot.slane %v2367_v42, %v3419_v50 }
 0x288   :  { %2206 = vmatpush1.bf16.msra.mxu0 %v3132_v21  ;;  %2292 = vmatpush1.bf16.msra.mxu1 %v3135_v22  ;;  %v2365_v22 = vrot.slane %v2360_v11, %v3419_v50 }
 0x289   :  { %2207 = vmatprep.subr.bf16.mxu0 %v3140_v23  ;;  %2293 = vmatprep.subr.bf16.mxu1 %v3143_v24 }
 0x28c   :  { %2208 = vmatpush1.bf16.msra.mxu0 %v3138_v25  ;;  %2294 = vmatpush1.bf16.msra.mxu1 %v3141_v26 }
 0x28d   :  { %2209 = vmatprep.subr.bf16.mxu0 %v3146_v27  ;;  %2295 = vmatprep.subr.bf16.mxu1 %v3149_v6 }
 0x290   :  { %2210 = vmatpush1.bf16.msra.mxu0 %v3144_v13  ;;  %2296 = vmatpush1.bf16.msra.mxu1 %v3147_v15  ;;  %v2396_v13 = vld [vmem:[%s3501_s7] sm:$0xf]  ;;  %v2404_v15 = vsub.s32 1, %v3404_v43 }
 0x291   :  { %2211 = vmatprep.subr.bf16.mxu0 %v3152_v29  ;;  %2297 = vmatprep.subr.bf16.mxu1 %v3155_v30 }
 0x294   :  { %2212 = vmatpush1.bf16.msra.mxu0 %v3150_v31  ;;  %2298 = vmatpush1.bf16.msra.mxu1 %v3153_v32  ;;  %v2408_v31 = vsub.s32 2, %v3404_v43 }
 0x295   :  { %2213 = vmatprep.subr.bf16.mxu0 %v3158_v33  ;;  %2299 = vmatprep.subr.bf16.mxu1 %v3161_v35 }
 0x298   :  { %2214 = vmatpush1.bf16.msra.mxu0 %v3156_v36  ;;  %2300 = vmatpush1.bf16.msra.mxu1 %v3159_v37  ;;  %v2401_v37 = vrot.slane %v2396_v13, %v3419_v50 }
 0x299   :  { %2215 = vmatprep.subr.bf16.mxu0 %v3164_v38  ;;  %2301 = vmatprep.subr.bf16.mxu1 %v3167_v40  ;;  %v2412_v38 = vsub.s32 3, %v3404_v43 }
 0x29c   :  { %2216 = vmatpush1.bf16.msra.mxu0 %v3162_v41  ;;  %2302 = vmatpush1.bf16.msra.mxu1 %v3165_v44  ;;  %v2405_v44 = vrot.slane %v2396_v13, %v2404_v15 }
 0x29d   :  { %2217 = vmatprep.subr.bf16.mxu0 %v3170_v46  ;;  %2303 = vmatprep.subr.bf16.mxu1 %v3173_v48 }
 0x2a0   :  { %2218 = vmatpush1.bf16.msra.mxu0 %v3168_v49  ;;  %2304 = vmatpush1.bf16.msra.mxu1 %v3171_v51  ;;  %v2409_v49 = vrot.slane %v2396_v13, %v2408_v31 }
 0x2a1   :  { %2219 = vmatprep.subr.bf16.mxu0 %v3176_v53  ;;  %2305 = vmatprep.subr.bf16.mxu1 %v3179_v54 }
 0x2a4   :  { %2220 = vmatpush1.bf16.msra.mxu0 %v3174_v55  ;;  %2306 = vmatpush1.bf16.msra.mxu1 %v3177_v56  ;;  %v2413_v55 = vrot.slane %v2396_v13, %v2412_v38 }
 0x2a5   :  { %2221 = vmatprep.subr.bf16.mxu0 %v3182_v1  ;;  %2307 = vmatprep.subr.bf16.mxu1 %v3185_v58 }
 0x2a8   :  { %2222 = vmatpush1.bf16.msra.mxu0 %v3180_v59  ;;  %2308 = vmatpush1.bf16.msra.mxu1 %v3183_v60 }
 0x2a9   :  { %2223 = vmatprep.subr.bf16.mxu0 %v3188_v28  ;;  %2309 = vmatprep.subr.bf16.mxu1 %v3191_v63 }
 0x2ac   :  { %2224 = vmatpush1.bf16.msra.mxu0 %v3186_v0  ;;  %2310 = vmatpush1.bf16.msra.mxu1 %v3189_v2 }
 0x2af   :  { %2226 = vmatmul.mubr.bf16.vlgmr.msra.gmra.mrb[8].mxu0 %v1380_v4  ;;  %2312 = vmatmul.mubr.bf16.vlgmr.msra.gmra.mrb[8].mxu1 %v1380_v4 }
 0x382   :  { %v2227_v14 = vpop.f32.mrb[8].mxu0  ;;  %v2313_v16 = vpop.f32.mrb[8].mxu1 }
 0x383   :  { %v2229_v47 = vpop.f32.mrb[9].mxu0  ;;  %v2315_v17 = vpop.f32.mrb[9].mxu1 }
 0x384   :  { %v2231_v20 = vpop.f32.mrb[10].mxu0  ;;  %v2317_v21 = vpop.f32.mrb[10].mxu1 }
 0x385   :  { %v2322_v23 = vpack.c.bf16 %v2231_v20, %v2227_v14  ;;  %v2324_v24 = vpack.c.bf16 %v2317_v21, %v2313_v16  ;;  %v2233_v25 = vpop.f32.mrb[11].mxu0  ;;  %v2319_v26 = vpop.f32.mrb[11].mxu1 }
 0x386   :  { %v2323_v27 = vpack.c.bf16 %v2233_v25, %v2229_v47  ;;  %v2325_v6 = vpack.c.bf16 %v2319_v26, %v2315_v17 }
 0x387   :  { %v2380_v29 = vadd.bf16 %v2358_v18, %v2322_v23  ;;  %v2382_v30 = vadd.bf16 %v2372_v19, %v2324_v24 }
 0x388   :  { %v2381_v32 = vadd.bf16 %v2365_v22, %v2323_v27  ;;  %v2383_v33 = vadd.bf16 %v2379_v45, %v2325_v6 }
 0x389   :  { %v2384_v35 = vmax.bf16 %v3298_v62, %v2380_v29  ;;  %v2386_v36 = vmax.bf16 %v3298_v62, %v2382_v30 }
 0x38a   :  { %v2385_v40 = vmax.bf16 %v3298_v62, %v2381_v32  ;;  %v2387_v41 = vmax.bf16 %v3298_v62, %v2383_v33 }
 0x38b   :  { %v2388_v46 = vunpack.c.l.bf16 %v2384_v35  ;;  %v2392_v48 = vunpack.c.h.bf16 %v2384_v35  ;;  %v2394_v51 = vunpack.c.h.bf16 %v2386_v36  ;;  %v2390_v54 = vunpack.c.l.bf16 %v2386_v36 }
 0x38c   :  { %v2389_v52 = vunpack.c.l.bf16 %v2385_v40  ;;  %v2393_v53 = vunpack.c.h.bf16 %v2385_v40  ;;  %v2391_v1 = vunpack.c.l.bf16 %v2387_v41  ;;  %v2395_v50 = vunpack.c.h.bf16 %v2387_v41 }
 0x38d   :  { %v2418_v56 = vmul.f32 %v2401_v37, %v2388_v46  ;;  %v2422_v57 = vmul.f32 %v2401_v37, %v2392_v48  ;;  %v2420_v43 = vmul.f32 %v2409_v49, %v2390_v54  ;;  %v2424_v61 = vmul.f32 %v2409_v49, %v2394_v51 }
 0x38e   :  { %v2419_v58 = vmul.f32 %v2405_v44, %v2389_v52  ;;  %v2423_v59 = vmul.f32 %v2405_v44, %v2393_v53  ;;  %v2421_v62 = vmul.f32 %v2413_v55, %v2391_v1  ;;  %v2425_v0 = vmul.f32 %v2413_v55, %v2395_v50 }
 0x390   :  { %v2426_v60 = vadd.f32 %v2419_v58, %v2418_v56  ;;  %v2431_v28 = vadd.f32 %v2423_v59, %v2422_v57 }
 0x392   :  { %v2427_v63 = vadd.f32 %v2426_v60, %v2420_v43  ;;  %v2432_v2 = vadd.f32 %v2431_v28, %v2424_v61 }
 0x394   :  { %v2428_v3 = vadd.f32 %v2427_v63, %v2421_v62  ;;  %v2433_v4 = vadd.f32 %v2432_v2, %v2425_v0 }
 0x396   :  { %2429 = vadd.xlane.f32.xlu0 %v2428_v3 }
 0x39a   :  { %2434 = vadd.xlane.f32.xlu0 %v2433_v4 }
 0x423   :  { %v2430_v7 = vpop.xlane.xlu0 %2429 }
 0x424   :  { %v2443_v8 = vadd.f32 %v2714_v5, %v2430_v7 }
 0x426   :  { %2446 = vst.msk [vmem:[%s3503_s9] sm:$0xff] %vm2445_vm0, %v2443_v8 }
 0x427   :  { %v2435_v9 = vpop.xlane.xlu0 %2434 }
 0x428   :  { %v2444_v10 = vadd.f32 %v2714_v5, %v2435_v9 }
 0x42a   :  { %2447 = vst.msk [vmem:[%s3503_s9 + $0x8] sm:$0xff] %vm2445_vm0, %v2444_v10 }
 0x42b   :  { %2452 = vsyncpa [#allocation4], 1 }
 0x42c   :  { %2453 = vsyncpa [#allocation6], 1 }
 0x42d   :  { %2454 = vsyncpa [#allocation9], 1 }

</bundles_post_ra>
